<compile_context>
chip_gen: v5e
topology: v5e:2x2
jax: 0.10.0
libtpu: 0.0.40
codegen_flags: <defaults>
</compile_context>

<pallas_src>
import jax
import jax.numpy as jnp
import numpy as np
from jax.experimental import pallas as pl
from jax.experimental.pallas import tpu as pltpu


_COMPILER_PARAMS = pltpu.CompilerParams(
    dimension_semantics=("parallel",),
    # Tiny footprint at these shapes. At production sizes tune per generation:
    # v5e/v6e (128 MiB VMEM) can go to 64-96 MiB for bigger blocks / deeper
    # buffering; v7x (64 MiB) should stay well below and tile spatially instead.
    vmem_limit_bytes=32 * 1024 * 1024,
)

# 3x3 taps in (di outer, dj inner) order -- must match the weight-matrix prep.
_TAPS = tuple((di, dj) for di in range(3) for dj in range(3))


def _elu(y):
    # ELU(alpha=1); exp only on the non-positive side to avoid overflow.
    return jnp.where(y > 0, y, jnp.exp(jnp.minimum(y, 0.0)) - 1.0)


# ---------------------------------------------------------------------------
# ResDown forward (Pallas)
# ---------------------------------------------------------------------------

def res_down_forward(x_nchw, params, eps=1e-4):
    f32, bf16 = jnp.float32, jnp.bfloat16
    n, cin, h, w = x_nchw.shape
    c1, _, kh, kw = params["w1"].shape          # conv1: cin -> c1 (= cout//2)
    c2 = params["w2"].shape[0]                  # conv2: c1 -> c2 ; conv3: cin -> c2
    assert (kh, kw) == (3, 3) and h % 2 == 0 and w % 2 == 0
    ho, wo = h // 2, w // 2                     # stride-2 output spatial dims
    hh, wh = ho + 1, wo + 1                     # phase-split spatial dims
    howo = ho * wo
    m = n * howo                                # rows entering each BatchNorm

    # ---------------- host-side layout prep (fused by XLA) ------------------
    # NCHW -> NHWC, zero-pad by 1, stride-2 phase split:
    #   phases[b*4 + 2r+s, A, B, c] = xpad[b, 2A+r, 2B+s, c]
    x = jnp.transpose(x_nchw, (0, 2, 3, 1)).astype(f32)
    xp = jnp.pad(x, ((0, 0), (1, 1), (1, 1), (0, 0)))
    phases = (xp.reshape(n, hh, 2, wh, 2, cin)
                .transpose(0, 2, 4, 1, 3, 5)
                .reshape(n * 4, hh, wh, cin))

    def wmat(w_oihw):
        # (O, I, 3, 3) -> (9, I, O), tap-major (di*3 + dj); bf16 MXU operands.
        o, i = w_oihw.shape[0], w_oihw.shape[1]
        return jnp.transpose(w_oihw, (2, 3, 1, 0)).reshape(9, i, o).astype(bf16)

    # Fused conv1|conv3 weights / biases (single GEMM per tap in K1).
    w13 = jnp.concatenate([wmat(params["w1"]), wmat(params["w3"])], axis=-1)  # (9, cin, c1+c2)
    b13 = jnp.concatenate([params["b1"], params["b3"]]).reshape(1, c1 + c2).astype(f32)
    w2m = wmat(params["w2"])                                                  # (9, c1, c2)
    b2 = params["b2"].reshape(1, c2).astype(f32)

    # ------------- K1: conv1 + conv3(skip) fused + BN1 partial stats --------
    def k1(ph_ref, w13_ref, b13_ref, h1_ref, skip_ref, s1_ref):
        acc = jnp.broadcast_to(b13_ref[...], (howo, c1 + c2))   # f32 accumulator
        for t, (di, dj) in enumerate(_TAPS):
            p = 2 * (di % 2) + (dj % 2)
            hs, ws = di // 2, dj // 2
            tap = ph_ref[p, hs:hs + ho, ws:ws + wo, :].reshape(howo, cin)
            acc = acc + jnp.dot(tap.astype(bf16), w13_ref[t],
                                preferred_element_type=f32)
        h1b = acc[:, :c1].astype(bf16)
        skb = acc[:, c1:].astype(bf16)
        h1_ref[0] = h1b
        skip_ref[0] = skb
        # BN1 partial stats from the values that will actually be normalized.
        h1f = h1b.astype(f32)
        s1_ref[0, 0:1, :] = jnp.sum(h1f, axis=0, keepdims=True)
        s1_ref[0, 1:2, :] = jnp.sum(h1f * h1f, axis=0, keepdims=True)

    h1, skip, s1 = pl.pallas_call(
        k1,
        grid=(n,),
        in_specs=[
            pl.BlockSpec((4, hh, wh, cin), lambda b: (b, 0, 0, 0)),
            pl.BlockSpec((9, cin, c1 + c2), lambda b: (0, 0, 0)),
            pl.BlockSpec((1, c1 + c2), lambda b: (0, 0)),
        ],
        out_specs=[
            pl.BlockSpec((1, howo, c1), lambda b: (b, 0, 0)),
            pl.BlockSpec((1, howo, c2), lambda b: (b, 0, 0)),
            pl.BlockSpec((1, 2, c1), lambda b: (b, 0, 0)),
        ],
        out_shape=[
            jax.ShapeDtypeStruct((n, howo, c1), bf16),
            jax.ShapeDtypeStruct((n, howo, c2), bf16),
            jax.ShapeDtypeStruct((n, 2, c1), f32),
        ],
        compiler_params=_COMPILER_PARAMS,
    )(phases, w13, b13)

    # Tiny glue: finish BN1 batch statistics (training mode, biased variance).
    s1_tot = jnp.sum(s1, axis=0)                     # (2, c1)
    mean1 = s1_tot[0] / m
    var1 = s1_tot[1] / m - mean1 * mean1
    scale1 = params["g1"] / jnp.sqrt(var1 + eps)
    shift1 = params["be1"] - mean1 * scale1

    # ----- K2: BN1 apply + ELU + conv2 + residual add + BN2 partial stats ---
    def k2(h1_ref, skip_ref, sc1_ref, sh1_ref, w2_ref, b2_ref,
           z_ref, s2_ref, hpad_ref):
        # Re-zero only the 1-pixel border of the padded scratch each step; the
        # interior is fully overwritten below.  (Scratch is per-core, so a
        # "zero once at program_id==0" trick would break under megacore
        # sharding of the parallel grid axis.)
        hpad_ref[0:1, :, :] = jnp.zeros((1, wo + 2, c1), f32)
        hpad_ref[ho + 1:ho + 2, :, :] = jnp.zeros((1, wo + 2, c1), f32)
        hpad_ref[:, 0:1, :] = jnp.zeros((ho + 2, 1, c1), f32)
        hpad_ref[:, wo + 1:wo + 2, :] = jnp.zeros((ho + 2, 1, c1), f32)

        y = h1_ref[0].astype(f32) * sc1_ref[...] + sh1_ref[...]   # BN1 affine
        act = _elu(y)                                             # (howo, c1)
        hpad_ref[1:1 + ho, 1:1 + wo, :] = act.reshape(ho, wo, c1)

        acc = skip_ref[0].astype(f32) + b2_ref[...]               # bias + skip
        for t, (di, dj) in enumerate(_TAPS):
            tap = hpad_ref[di:di + ho, dj:dj + wo, :].reshape(howo, c1)
            acc = acc + jnp.dot(tap.astype(bf16), w2_ref[t],
                                preferred_element_type=f32)
        zb = acc.astype(bf16)
        z_ref[0] = zb
        zf = zb.astype(f32)
        s2_ref[0, 0:1, :] = jnp.sum(zf, axis=0, keepdims=True)
        s2_ref[0, 1:2, :] = jnp.sum(zf * zf, axis=0, keepdims=True)

    z, s2 = pl.pallas_call(
        k2,
        grid=(n,),
        in_specs=[
            pl.BlockSpec((1, howo, c1), lambda b: (b, 0, 0)),
            pl.BlockSpec((1, howo, c2), lambda b: (b, 0, 0)),
            pl.BlockSpec((1, c1), lambda b: (0, 0)),
            pl.BlockSpec((1, c1), lambda b: (0, 0)),
            pl.BlockSpec((9, c1, c2), lambda b: (0, 0, 0)),
            pl.BlockSpec((1, c2), lambda b: (0, 0)),
        ],
        out_specs=[
            pl.BlockSpec((1, howo, c2), lambda b: (b, 0, 0)),
            pl.BlockSpec((1, 2, c2), lambda b: (b, 0, 0)),
        ],
        out_shape=[
            jax.ShapeDtypeStruct((n, howo, c2), bf16),
            jax.ShapeDtypeStruct((n, 2, c2), f32),
        ],
        scratch_shapes=[pltpu.VMEM((ho + 2, wo + 2, c1), f32)],
        compiler_params=_COMPILER_PARAMS,
    )(h1, skip,
      scale1.reshape(1, c1).astype(f32), shift1.reshape(1, c1).astype(f32),
      w2m, b2)

    s2_tot = jnp.sum(s2, axis=0)                     # (2, c2)
    mean2 = s2_tot[0] / m
    var2 = s2_tot[1] / m - mean2 * mean2
    scale2 = params["g2"] / jnp.sqrt(var2 + eps)
    shift2 = params["be2"] - mean2 * scale2

    # -------- K3: BN2 apply + ELU + in-VMEM transpose to NCHW layout --------
    def k3(z_ref, sc2_ref, sh2_ref, o_ref):
        y = _elu(z_ref[0].astype(f32) * sc2_ref[...] + sh2_ref[...])  # (howo, c2)
        o_ref[0] = jnp.transpose(y)                                   # (c2, howo) lane-dense

    out_t = pl.pallas_call(
        k3,
        grid=(n,),
        in_specs=[
            pl.BlockSpec((1, howo, c2), lambda b: (b, 0, 0)),
            pl.BlockSpec((1, c2), lambda b: (0, 0)),
            pl.BlockSpec((1, c2), lambda b: (0, 0)),
        ],
        out_specs=pl.BlockSpec((1, c2, howo), lambda b: (b, 0, 0)),
        out_shape=jax.ShapeDtypeStruct((n, c2, howo), f32),
        compiler_params=_COMPILER_PARAMS,
    )(z, scale2.reshape(1, c2).astype(f32), shift2.reshape(1, c2).astype(f32))

    # Row-major reshape only -- already in NCHW order, no extra HBM pass.
    return out_t.reshape(n, c2, ho, wo)


# ---------------------------------------------------------------------------
# Pure-JAX reference (f32, for correctness check)
# ---------------------------------------------------------------------------

def _ref_conv(x, w, b, stride, pad):
    y = jax.lax.conv_general_dilated(
        x, w, (stride, stride), [(pad, pad), (pad, pad)],
        dimension_numbers=("NCHW", "OIHW", "NCHW"))
    return y + b.reshape(1, -1, 1, 1)


def _ref_bn_elu(x, gamma, beta, eps):
    mean = jnp.mean(x, axis=(0, 2, 3), keepdims=True)
    var = jnp.mean((x - mean) ** 2, axis=(0, 2, 3), keepdims=True)
    y = (x - mean) / jnp.sqrt(var + eps)
    y = y * gamma.reshape(1, -1, 1, 1) + beta.reshape(1, -1, 1, 1)
    return jnp.where(y > 0, y, jnp.exp(jnp.minimum(y, 0.0)) - 1.0)


def _ref_forward(x, p, eps=1e-4):
    skip = _ref_conv(x, p["w3"], p["b3"], 2, 1)
    h = _ref_bn_elu(_ref_conv(x, p["w1"], p["b1"], 2, 1), p["g1"], p["be1"], eps)
    h = _ref_conv(h, p["w2"], p["b2"], 1, 1)
    return _ref_bn_elu(h + skip, p["g2"], p["be2"], eps)


# ---------------------------------------------------------------------------
# Main
# ---------------------------------------------------------------------------

if __name__ == "__main__":
    key = jax.random.PRNGKey(0)
    channel_in, channel_out, k = 4, 8, 3
    N, H, W = 2, 16, 16

    keys = jax.random.split(key, 8)
    params = {
        # conv1: channel_in -> channel_out//2, stride 2
        "w1": 0.2 * jax.random.normal(keys[0], (channel_out // 2, channel_in, k, k), jnp.float32),
        "b1": 0.1 * jax.random.normal(keys[1], (channel_out // 2,), jnp.float32),
        # conv2: channel_out//2 -> channel_out, stride 1
        "w2": 0.2 * jax.random.normal(keys[2], (channel_out, channel_out // 2, k, k), jnp.float32),
        "b2": 0.1 * jax.random.normal(keys[3], (channel_out,), jnp.float32),
        # conv3 (skip): channel_in -> channel_out, stride 2
        "w3": 0.2 * jax.random.normal(keys[4], (channel_out, channel_in, k, k), jnp.float32),
        "b3": 0.1 * jax.random.normal(keys[5], (channel_out,), jnp.float32),
        # BatchNorm affine params (PyTorch init: gamma=1, beta=0)
        "g1": jnp.ones((channel_out // 2,), jnp.float32),
        "be1": jnp.zeros((channel_out // 2,), jnp.float32),
        "g2": jnp.ones((channel_out,), jnp.float32),
        "be2": jnp.zeros((channel_out,), jnp.float32),
    }

    x = jax.random.normal(keys[6], (N, channel_in, H, W), jnp.float32)

    fwd = jax.jit(res_down_forward)
    out = jax.block_until_ready(fwd(x, params))
    ref = jax.block_until_ready(_ref_forward(x, params))

    assert out.shape == (N, channel_out, H // 2, W // 2), out.shape
    # Tolerance reflects bf16 MXU operands + bf16 HBM intermediates vs f32 ref.
    np.testing.assert_allclose(np.asarray(out), np.asarray(ref), rtol=5e-2, atol=5e-2)

    print("KERNEL_OK")
</pallas_src>

<mosaic_0001>
module attributes {stable_mosaic.version = 11 : i64} {
  func.func @k1(%arg0: i32, %arg1: memref<4x9x9x4xf32, #tpu.memory_space<vmem>>, %arg2: memref<9x4x12xbf16, #tpu.memory_space<vmem>>, %arg3: memref<1x12xf32, #tpu.memory_space<vmem>>, %arg4: memref<1x64x4xbf16, #tpu.memory_space<vmem>>, %arg5: memref<1x64x8xbf16, #tpu.memory_space<vmem>>, %arg6: memref<1x2x4xf32, #tpu.memory_space<vmem>>) attributes {dimension_semantics = [#tpu.dimension_semantics<parallel>], iteration_bounds = array<i64: 2>, scalar_prefetch = 0 : i64, scratch_operands = 0 : i64, tpu.core_type = #tpu.core_type<tc>, window_params = [{transform_indices = @transform_0, window_bounds = array<i64: 4, 9, 9, 4>}, {pipeline_mode = #tpu.pipeline_mode<synchronous>, transform_indices = @transform_1, window_bounds = array<i64: 9, 4, 12>}, {pipeline_mode = #tpu.pipeline_mode<synchronous>, transform_indices = @transform_2, window_bounds = array<i64: 1, 12>}, {transform_indices = @transform_3, window_bounds = array<i64: 1, 64, 4>}, {transform_indices = @transform_4, window_bounds = array<i64: 1, 64, 8>}, {transform_indices = @transform_5, window_bounds = array<i64: 1, 2, 4>}]} {
    %c0 = arith.constant 0 : index
    %c0_0 = arith.constant 0 : index
    %0 = vector.load %arg3[%c0, %c0_0] : memref<1x12xf32, #tpu.memory_space<vmem>>, vector<1x12xf32>
    %1 = vector.shape_cast %0 : vector<1x12xf32> to vector<1x12xf32>
    %2 = vector.broadcast %1 : vector<1x12xf32> to vector<64x12xf32>
    %c0_1 = arith.constant 0 : index
    %c0_2 = arith.constant 0 : index
    %c0_3 = arith.constant 0 : index
    %c0_4 = arith.constant 0 : index
    %3 = vector.load %arg1[%c0_1, %c0_2, %c0_3, %c0_4] : memref<4x9x9x4xf32, #tpu.memory_space<vmem>>, vector<1x8x8x4xf32>
    %4 = vector.shape_cast %3 : vector<1x8x8x4xf32> to vector<8x8x4xf32>
    %5 = vector.shape_cast %4 : vector<8x8x4xf32> to vector<64x4xf32>
    %6 = arith.truncf %5 : vector<64x4xf32> to vector<64x4xbf16>
    %c0_5 = arith.constant 0 : index
    %c0_6 = arith.constant 0 : index
    %c0_7 = arith.constant 0 : index
    %7 = vector.load %arg2[%c0_5, %c0_6, %c0_7] : memref<9x4x12xbf16, #tpu.memory_space<vmem>>, vector<1x4x12xbf16>
    %8 = vector.shape_cast %7 : vector<1x4x12xbf16> to vector<4x12xbf16>
    %cst = arith.constant dense<0.000000e+00> : vector<64x12xf32>
    %9 = tpu.matmul %6, %8, %cst {dimension_numbers = #tpu.dot_dimension_numbers<[1], [0], [0], [1], [0, 0, 1, 1], [], []>} : vector<64x4xbf16>, vector<4x12xbf16>, vector<64x12xf32> -> vector<64x12xf32>
    %10 = arith.addf %2, %9 : vector<64x12xf32>
    %c1 = arith.constant 1 : index
    %c0_8 = arith.constant 0 : index
    %c0_9 = arith.constant 0 : index
    %c0_10 = arith.constant 0 : index
    %11 = vector.load %arg1[%c1, %c0_8, %c0_9, %c0_10] : memref<4x9x9x4xf32, #tpu.memory_space<vmem>>, vector<1x8x8x4xf32>
    %12 = vector.shape_cast %11 : vector<1x8x8x4xf32> to vector<8x8x4xf32>
    %13 = vector.shape_cast %12 : vector<8x8x4xf32> to vector<64x4xf32>
    %14 = arith.truncf %13 : vector<64x4xf32> to vector<64x4xbf16>
    %c1_11 = arith.constant 1 : index
    %c0_12 = arith.constant 0 : index
    %c0_13 = arith.constant 0 : index
    %15 = vector.load %arg2[%c1_11, %c0_12, %c0_13] : memref<9x4x12xbf16, #tpu.memory_space<vmem>>, vector<1x4x12xbf16>
    %16 = vector.shape_cast %15 : vector<1x4x12xbf16> to vector<4x12xbf16>
    %cst_14 = arith.constant dense<0.000000e+00> : vector<64x12xf32>
    %17 = tpu.matmul %14, %16, %cst_14 {dimension_numbers = #tpu.dot_dimension_numbers<[1], [0], [0], [1], [0, 0, 1, 1], [], []>} : vector<64x4xbf16>, vector<4x12xbf16>, vector<64x12xf32> -> vector<64x12xf32>
    %18 = arith.addf %10, %17 : vector<64x12xf32>
    %c0_15 = arith.constant 0 : index
    %c0_16 = arith.constant 0 : index
    %c1_17 = arith.constant 1 : index
    %c0_18 = arith.constant 0 : index
    %19 = vector.load %arg1[%c0_15, %c0_16, %c1_17, %c0_18] : memref<4x9x9x4xf32, #tpu.memory_space<vmem>>, vector<1x8x8x4xf32>
    %20 = vector.shape_cast %19 : vector<1x8x8x4xf32> to vector<8x8x4xf32>
    %21 = vector.shape_cast %20 : vector<8x8x4xf32> to vector<64x4xf32>
    %22 = arith.truncf %21 : vector<64x4xf32> to vector<64x4xbf16>
    %c2 = arith.constant 2 : index
    %c0_19 = arith.constant 0 : index
    %c0_20 = arith.constant 0 : index
    %23 = vector.load %arg2[%c2, %c0_19, %c0_20] : memref<9x4x12xbf16, #tpu.memory_space<vmem>>, vector<1x4x12xbf16>
    %24 = vector.shape_cast %23 : vector<1x4x12xbf16> to vector<4x12xbf16>
    %cst_21 = arith.constant dense<0.000000e+00> : vector<64x12xf32>
    %25 = tpu.matmul %22, %24, %cst_21 {dimension_numbers = #tpu.dot_dimension_numbers<[1], [0], [0], [1], [0, 0, 1, 1], [], []>} : vector<64x4xbf16>, vector<4x12xbf16>, vector<64x12xf32> -> vector<64x12xf32>
    %26 = arith.addf %18, %25 : vector<64x12xf32>
    %c2_22 = arith.constant 2 : index
    %c0_23 = arith.constant 0 : index
    %c0_24 = arith.constant 0 : index
    %c0_25 = arith.constant 0 : index
    %27 = vector.load %arg1[%c2_22, %c0_23, %c0_24, %c0_25] : memref<4x9x9x4xf32, #tpu.memory_space<vmem>>, vector<1x8x8x4xf32>
    %28 = vector.shape_cast %27 : vector<1x8x8x4xf32> to vector<8x8x4xf32>
    %29 = vector.shape_cast %28 : vector<8x8x4xf32> to vector<64x4xf32>
    %30 = arith.truncf %29 : vector<64x4xf32> to vector<64x4xbf16>
    %c3 = arith.constant 3 : index
    %c0_26 = arith.constant 0 : index
    %c0_27 = arith.constant 0 : index
    %31 = vector.load %arg2[%c3, %c0_26, %c0_27] : memref<9x4x12xbf16, #tpu.memory_space<vmem>>, vector<1x4x12xbf16>
    %32 = vector.shape_cast %31 : vector<1x4x12xbf16> to vector<4x12xbf16>
    %cst_28 = arith.constant dense<0.000000e+00> : vector<64x12xf32>
    %33 = tpu.matmul %30, %32, %cst_28 {dimension_numbers = #tpu.dot_dimension_numbers<[1], [0], [0], [1], [0, 0, 1, 1], [], []>} : vector<64x4xbf16>, vector<4x12xbf16>, vector<64x12xf32> -> vector<64x12xf32>
    %34 = arith.addf %26, %33 : vector<64x12xf32>
    %c3_29 = arith.constant 3 : index
    %c0_30 = arith.constant 0 : index
    %c0_31 = arith.constant 0 : index
    %c0_32 = arith.constant 0 : index
    %35 = vector.load %arg1[%c3_29, %c0_30, %c0_31, %c0_32] : memref<4x9x9x4xf32, #tpu.memory_space<vmem>>, vector<1x8x8x4xf32>
    %36 = vector.shape_cast %35 : vector<1x8x8x4xf32> to vector<8x8x4xf32>
    %37 = vector.shape_cast %36 : vector<8x8x4xf32> to vector<64x4xf32>
    %38 = arith.truncf %37 : vector<64x4xf32> to vector<64x4xbf16>
    %c4 = arith.constant 4 : index
    %c0_33 = arith.constant 0 : index
    %c0_34 = arith.constant 0 : index
    %39 = vector.load %arg2[%c4, %c0_33, %c0_34] : memref<9x4x12xbf16, #tpu.memory_space<vmem>>, vector<1x4x12xbf16>
    %40 = vector.shape_cast %39 : vector<1x4x12xbf16> to vector<4x12xbf16>
    %cst_35 = arith.constant dense<0.000000e+00> : vector<64x12xf32>
    %41 = tpu.matmul %38, %40, %cst_35 {dimension_numbers = #tpu.dot_dimension_numbers<[1], [0], [0], [1], [0, 0, 1, 1], [], []>} : vector<64x4xbf16>, vector<4x12xbf16>, vector<64x12xf32> -> vector<64x12xf32>
    %42 = arith.addf %34, %41 : vector<64x12xf32>
    %c2_36 = arith.constant 2 : index
    %c0_37 = arith.constant 0 : index
    %c1_38 = arith.constant 1 : index
    %c0_39 = arith.constant 0 : index
    %43 = vector.load %arg1[%c2_36, %c0_37, %c1_38, %c0_39] : memref<4x9x9x4xf32, #tpu.memory_space<vmem>>, vector<1x8x8x4xf32>
    %44 = vector.shape_cast %43 : vector<1x8x8x4xf32> to vector<8x8x4xf32>
    %45 = vector.shape_cast %44 : vector<8x8x4xf32> to vector<64x4xf32>
    %46 = arith.truncf %45 : vector<64x4xf32> to vector<64x4xbf16>
    %c5 = arith.constant 5 : index
    %c0_40 = arith.constant 0 : index
    %c0_41 = arith.constant 0 : index
    %47 = vector.load %arg2[%c5, %c0_40, %c0_41] : memref<9x4x12xbf16, #tpu.memory_space<vmem>>, vector<1x4x12xbf16>
    %48 = vector.shape_cast %47 : vector<1x4x12xbf16> to vector<4x12xbf16>
    %cst_42 = arith.constant dense<0.000000e+00> : vector<64x12xf32>
    %49 = tpu.matmul %46, %48, %cst_42 {dimension_numbers = #tpu.dot_dimension_numbers<[1], [0], [0], [1], [0, 0, 1, 1], [], []>} : vector<64x4xbf16>, vector<4x12xbf16>, vector<64x12xf32> -> vector<64x12xf32>
    %50 = arith.addf %42, %49 : vector<64x12xf32>
    %c0_43 = arith.constant 0 : index
    %c1_44 = arith.constant 1 : index
    %c0_45 = arith.constant 0 : index
    %c0_46 = arith.constant 0 : index
    %51 = vector.load %arg1[%c0_43, %c1_44, %c0_45, %c0_46] : memref<4x9x9x4xf32, #tpu.memory_space<vmem>>, vector<1x8x8x4xf32>
    %52 = vector.shape_cast %51 : vector<1x8x8x4xf32> to vector<8x8x4xf32>
    %53 = vector.shape_cast %52 : vector<8x8x4xf32> to vector<64x4xf32>
    %54 = arith.truncf %53 : vector<64x4xf32> to vector<64x4xbf16>
    %c6 = arith.constant 6 : index
    %c0_47 = arith.constant 0 : index
    %c0_48 = arith.constant 0 : index
    %55 = vector.load %arg2[%c6, %c0_47, %c0_48] : memref<9x4x12xbf16, #tpu.memory_space<vmem>>, vector<1x4x12xbf16>
    %56 = vector.shape_cast %55 : vector<1x4x12xbf16> to vector<4x12xbf16>
    %cst_49 = arith.constant dense<0.000000e+00> : vector<64x12xf32>
    %57 = tpu.matmul %54, %56, %cst_49 {dimension_numbers = #tpu.dot_dimension_numbers<[1], [0], [0], [1], [0, 0, 1, 1], [], []>} : vector<64x4xbf16>, vector<4x12xbf16>, vector<64x12xf32> -> vector<64x12xf32>
    %58 = arith.addf %50, %57 : vector<64x12xf32>
    %c1_50 = arith.constant 1 : index
    %c1_51 = arith.constant 1 : index
    %c0_52 = arith.constant 0 : index
    %c0_53 = arith.constant 0 : index
    %59 = vector.load %arg1[%c1_50, %c1_51, %c0_52, %c0_53] : memref<4x9x9x4xf32, #tpu.memory_space<vmem>>, vector<1x8x8x4xf32>
    %60 = vector.shape_cast %59 : vector<1x8x8x4xf32> to vector<8x8x4xf32>
    %61 = vector.shape_cast %60 : vector<8x8x4xf32> to vector<64x4xf32>
    %62 = arith.truncf %61 : vector<64x4xf32> to vector<64x4xbf16>
    %c7 = arith.constant 7 : index
    %c0_54 = arith.constant 0 : index
    %c0_55 = arith.constant 0 : index
    %63 = vector.load %arg2[%c7, %c0_54, %c0_55] : memref<9x4x12xbf16, #tpu.memory_space<vmem>>, vector<1x4x12xbf16>
    %64 = vector.shape_cast %63 : vector<1x4x12xbf16> to vector<4x12xbf16>
    %cst_56 = arith.constant dense<0.000000e+00> : vector<64x12xf32>
    %65 = tpu.matmul %62, %64, %cst_56 {dimension_numbers = #tpu.dot_dimension_numbers<[1], [0], [0], [1], [0, 0, 1, 1], [], []>} : vector<64x4xbf16>, vector<4x12xbf16>, vector<64x12xf32> -> vector<64x12xf32>
    %66 = arith.addf %58, %65 : vector<64x12xf32>
    %c0_57 = arith.constant 0 : index
    %c1_58 = arith.constant 1 : index
    %c1_59 = arith.constant 1 : index
    %c0_60 = arith.constant 0 : index
    %67 = vector.load %arg1[%c0_57, %c1_58, %c1_59, %c0_60] : memref<4x9x9x4xf32, #tpu.memory_space<vmem>>, vector<1x8x8x4xf32>
    %68 = vector.shape_cast %67 : vector<1x8x8x4xf32> to vector<8x8x4xf32>
    %69 = vector.shape_cast %68 : vector<8x8x4xf32> to vector<64x4xf32>
    %70 = arith.truncf %69 : vector<64x4xf32> to vector<64x4xbf16>
    %c8 = arith.constant 8 : index
    %c0_61 = arith.constant 0 : index
    %c0_62 = arith.constant 0 : index
    %71 = vector.load %arg2[%c8, %c0_61, %c0_62] : memref<9x4x12xbf16, #tpu.memory_space<vmem>>, vector<1x4x12xbf16>
    %72 = vector.shape_cast %71 : vector<1x4x12xbf16> to vector<4x12xbf16>
    %cst_63 = arith.constant dense<0.000000e+00> : vector<64x12xf32>
    %73 = tpu.matmul %70, %72, %cst_63 {dimension_numbers = #tpu.dot_dimension_numbers<[1], [0], [0], [1], [0, 0, 1, 1], [], []>} : vector<64x4xbf16>, vector<4x12xbf16>, vector<64x12xf32> -> vector<64x12xf32>
    %74 = arith.addf %66, %73 : vector<64x12xf32>
    %75 = vector.extract_strided_slice %74 {offsets = [0, 0], sizes = [64, 4], strides = [1, 1]} : vector<64x12xf32> to vector<64x4xf32>
    %76 = arith.truncf %75 : vector<64x4xf32> to vector<64x4xbf16>
    %77 = vector.extract_strided_slice %74 {offsets = [0, 4], sizes = [64, 8], strides = [1, 1]} : vector<64x12xf32> to vector<64x8xf32>
    %78 = arith.truncf %77 : vector<64x8xf32> to vector<64x8xbf16>
    %c0_64 = arith.constant 0 : index
    %c0_65 = arith.constant 0 : index
    %c0_66 = arith.constant 0 : index
    %79 = vector.load %arg4[%c0_64, %c0_65, %c0_66] : memref<1x64x4xbf16, #tpu.memory_space<vmem>>, vector<1x64x4xbf16>
    %80 = vector.shape_cast %79 : vector<1x64x4xbf16> to vector<64x4xbf16>
    %81 = vector.shape_cast %76 : vector<64x4xbf16> to vector<1x64x4xbf16>
    tpu.vector_store %arg4[%c0_64, %c0_65, %c0_66], %81 {strides = array<i32>} : memref<1x64x4xbf16, #tpu.memory_space<vmem>>, vector<1x64x4xbf16>,
    %c0_67 = arith.constant 0 : index
    %c0_68 = arith.constant 0 : index
    %c0_69 = arith.constant 0 : index
    %82 = vector.load %arg5[%c0_67, %c0_68, %c0_69] : memref<1x64x8xbf16, #tpu.memory_space<vmem>>, vector<1x64x8xbf16>
    %83 = vector.shape_cast %82 : vector<1x64x8xbf16> to vector<64x8xbf16>
    %84 = vector.shape_cast %78 : vector<64x8xbf16> to vector<1x64x8xbf16>
    tpu.vector_store %arg5[%c0_67, %c0_68, %c0_69], %84 {strides = array<i32>} : memref<1x64x8xbf16, #tpu.memory_space<vmem>>, vector<1x64x8xbf16>,
    %85 = arith.extf %76 : vector<64x4xbf16> to vector<64x4xf32>
    %cst_70 = arith.constant dense<0.000000e+00> : vector<4xf32>
    %86 = vector.multi_reduction <add>, %85, %cst_70 [0] : vector<64x4xf32> to vector<4xf32>
    %87 = vector.shape_cast %86 : vector<4xf32> to vector<1x4xf32>
    %c0_71 = arith.constant 0 : index
    %c0_72 = arith.constant 0 : index
    %c0_73 = arith.constant 0 : index
    %88 = vector.load %arg6[%c0_71, %c0_72, %c0_73] : memref<1x2x4xf32, #tpu.memory_space<vmem>>, vector<1x1x4xf32>
    %89 = vector.shape_cast %88 : vector<1x1x4xf32> to vector<1x4xf32>
    %90 = vector.shape_cast %87 : vector<1x4xf32> to vector<1x1x4xf32>
    tpu.vector_store %arg6[%c0_71, %c0_72, %c0_73], %90 {strides = array<i32>} : memref<1x2x4xf32, #tpu.memory_space<vmem>>, vector<1x1x4xf32>,
    %91 = arith.mulf %85, %85 : vector<64x4xf32>
    %cst_74 = arith.constant dense<0.000000e+00> : vector<4xf32>
    %92 = vector.multi_reduction <add>, %91, %cst_74 [0] : vector<64x4xf32> to vector<4xf32>
    %93 = vector.shape_cast %92 : vector<4xf32> to vector<1x4xf32>
    %c0_75 = arith.constant 0 : index
    %c1_76 = arith.constant 1 : index
    %c0_77 = arith.constant 0 : index
    %94 = vector.load %arg6[%c0_75, %c1_76, %c0_77] : memref<1x2x4xf32, #tpu.memory_space<vmem>>, vector<1x1x4xf32>
    %95 = vector.shape_cast %94 : vector<1x1x4xf32> to vector<1x4xf32>
    %96 = vector.shape_cast %93 : vector<1x4xf32> to vector<1x1x4xf32>
    tpu.vector_store %arg6[%c0_75, %c1_76, %c0_77], %96 {strides = array<i32>} : memref<1x2x4xf32, #tpu.memory_space<vmem>>, vector<1x1x4xf32>,
    return
  }
  func.func @transform_0(%arg0: i32) -> (i32, i32, i32, i32) {
    %c0_i32 = arith.constant 0 : i32
    %c0_i32_0 = arith.constant 0 : i32
    %c0_i32_1 = arith.constant 0 : i32
    %c0_i32_2 = arith.constant 0 : i32
    return %arg0, %c0_i32, %c0_i32_0, %c0_i32_1 : i32, i32, i32, i32
  }
  func.func @transform_1(%arg0: i32) -> (i32, i32, i32) {
    %c0_i32 = arith.constant 0 : i32
    %c0_i32_0 = arith.constant 0 : i32
    %c0_i32_1 = arith.constant 0 : i32
    %c0_i32_2 = arith.constant 0 : i32
    return %c0_i32, %c0_i32_0, %c0_i32_1 : i32, i32, i32
  }
  func.func @transform_2(%arg0: i32) -> (i32, i32) {
    %c0_i32 = arith.constant 0 : i32
    %c0_i32_0 = arith.constant 0 : i32
    %c0_i32_1 = arith.constant 0 : i32
    return %c0_i32, %c0_i32_0 : i32, i32
  }
  func.func @transform_3(%arg0: i32) -> (i32, i32, i32) {
    %c0_i32 = arith.constant 0 : i32
    %c0_i32_0 = arith.constant 0 : i32
    %c0_i32_1 = arith.constant 0 : i32
    return %arg0, %c0_i32, %c0_i32_0 : i32, i32, i32
  }
  func.func @transform_4(%arg0: i32) -> (i32, i32, i32) {
    %c0_i32 = arith.constant 0 : i32
    %c0_i32_0 = arith.constant 0 : i32
    %c0_i32_1 = arith.constant 0 : i32
    return %arg0, %c0_i32, %c0_i32_0 : i32, i32, i32
  }
  func.func @transform_5(%arg0: i32) -> (i32, i32, i32) {
    %c0_i32 = arith.constant 0 : i32
    %c0_i32_0 = arith.constant 0 : i32
    %c0_i32_1 = arith.constant 0 : i32
    return %arg0, %c0_i32, %c0_i32_0 : i32, i32, i32
  }
}

module attributes {stable_mosaic.version = 11 : i64} {
  func.func @k2(%arg0: i32, %arg1: memref<1x64x4xbf16, #tpu.memory_space<vmem>>, %arg2: memref<1x64x8xbf16, #tpu.memory_space<vmem>>, %arg3: memref<1x4xf32, #tpu.memory_space<vmem>>, %arg4: memref<1x4xf32, #tpu.memory_space<vmem>>, %arg5: memref<9x4x8xbf16, #tpu.memory_space<vmem>>, %arg6: memref<1x8xf32, #tpu.memory_space<vmem>>, %arg7: memref<1x64x8xbf16, #tpu.memory_space<vmem>>, %arg8: memref<1x2x8xf32, #tpu.memory_space<vmem>>, %arg9: memref<10x10x4xf32, #tpu.memory_space<vmem>>) attributes {dimension_semantics = [#tpu.dimension_semantics<parallel>], iteration_bounds = array<i64: 2>, scalar_prefetch = 0 : i64, scratch_operands = 1 : i64, tpu.core_type = #tpu.core_type<tc>, window_params = [{transform_indices = @transform_0, window_bounds = array<i64: 1, 64, 4>}, {transform_indices = @transform_1, window_bounds = array<i64: 1, 64, 8>}, {pipeline_mode = #tpu.pipeline_mode<synchronous>, transform_indices = @transform_2, window_bounds = array<i64: 1, 4>}, {pipeline_mode = #tpu.pipeline_mode<synchronous>, transform_indices = @transform_3, window_bounds = array<i64: 1, 4>}, {pipeline_mode = #tpu.pipeline_mode<synchronous>, transform_indices = @transform_4, window_bounds = array<i64: 9, 4, 8>}, {pipeline_mode = #tpu.pipeline_mode<synchronous>, transform_indices = @transform_5, window_bounds = array<i64: 1, 8>}, {transform_indices = @transform_6, window_bounds = array<i64: 1, 64, 8>}, {transform_indices = @transform_7, window_bounds = array<i64: 1, 2, 8>}]} {
    %cst = arith.constant 0.000000e+00 : f32
    %0 = vector.broadcast %cst : f32 to vector<1x10x4xf32>
    %c0 = arith.constant 0 : index
    %c0_0 = arith.constant 0 : index
    %c0_1 = arith.constant 0 : index
    %1 = vector.load %arg9[%c0, %c0_0, %c0_1] : memref<10x10x4xf32, #tpu.memory_space<vmem>>, vector<1x10x4xf32>
    tpu.vector_store %arg9[%c0, %c0_0, %c0_1], %0 {strides = array<i32>} : memref<10x10x4xf32, #tpu.memory_space<vmem>>, vector<1x10x4xf32>,
    %cst_2 = arith.constant 0.000000e+00 : f32
    %2 = vector.broadcast %cst_2 : f32 to vector<1x10x4xf32>
    %c9 = arith.constant 9 : index
    %c0_3 = arith.constant 0 : index
    %c0_4 = arith.constant 0 : index
    %3 = vector.load %arg9[%c9, %c0_3, %c0_4] : memref<10x10x4xf32, #tpu.memory_space<vmem>>, vector<1x10x4xf32>
    tpu.vector_store %arg9[%c9, %c0_3, %c0_4], %2 {strides = array<i32>} : memref<10x10x4xf32, #tpu.memory_space<vmem>>, vector<1x10x4xf32>,
    %cst_5 = arith.constant 0.000000e+00 : f32
    %4 = vector.broadcast %cst_5 : f32 to vector<10x1x4xf32>
    %c0_6 = arith.constant 0 : index
    %c0_7 = arith.constant 0 : index
    %c0_8 = arith.constant 0 : index
    %5 = vector.load %arg9[%c0_6, %c0_7, %c0_8] : memref<10x10x4xf32, #tpu.memory_space<vmem>>, vector<10x1x4xf32>
    tpu.vector_store %arg9[%c0_6, %c0_7, %c0_8], %4 {strides = array<i32>} : memref<10x10x4xf32, #tpu.memory_space<vmem>>, vector<10x1x4xf32>,
    %cst_9 = arith.constant 0.000000e+00 : f32
    %6 = vector.broadcast %cst_9 : f32 to vector<10x1x4xf32>
    %c0_10 = arith.constant 0 : index
    %c9_11 = arith.constant 9 : index
    %c0_12 = arith.constant 0 : index
    %7 = vector.load %arg9[%c0_10, %c9_11, %c0_12] : memref<10x10x4xf32, #tpu.memory_space<vmem>>, vector<10x1x4xf32>
    tpu.vector_store %arg9[%c0_10, %c9_11, %c0_12], %6 {strides = array<i32>} : memref<10x10x4xf32, #tpu.memory_space<vmem>>, vector<10x1x4xf32>,
    %c0_13 = arith.constant 0 : index
    %c0_14 = arith.constant 0 : index
    %c0_15 = arith.constant 0 : index
    %8 = vector.load %arg1[%c0_13, %c0_14, %c0_15] : memref<1x64x4xbf16, #tpu.memory_space<vmem>>, vector<1x64x4xbf16>
    %9 = vector.shape_cast %8 : vector<1x64x4xbf16> to vector<64x4xbf16>
    %10 = arith.extf %9 : vector<64x4xbf16> to vector<64x4xf32>
    %c0_16 = arith.constant 0 : index
    %c0_17 = arith.constant 0 : index
    %11 = vector.load %arg3[%c0_16, %c0_17] : memref<1x4xf32, #tpu.memory_space<vmem>>, vector<1x4xf32>
    %12 = vector.broadcast %11 : vector<1x4xf32> to vector<64x4xf32>
    %13 = arith.mulf %10, %12 : vector<64x4xf32>
    %c0_18 = arith.constant 0 : index
    %c0_19 = arith.constant 0 : index
    %14 = vector.load %arg4[%c0_18, %c0_19] : memref<1x4xf32, #tpu.memory_space<vmem>>, vector<1x4xf32>
    %15 = vector.broadcast %14 : vector<1x4xf32> to vector<64x4xf32>
    %16 = arith.addf %13, %15 : vector<64x4xf32>
    %cst_20 = arith.constant 0.000000e+00 : f32
    %17 = vector.broadcast %cst_20 : f32 to vector<64x4xf32>
    %18 = arith.cmpf ogt, %16, %17 : vector<64x4xf32>
    %cst_21 = arith.constant 0.000000e+00 : f32
    %19 = vector.broadcast %cst_21 : f32 to vector<64x4xf32>
    %20 = arith.minimumf %16, %19 : vector<64x4xf32>
    %21 = math.exp %20 : vector<64x4xf32>
    %cst_22 = arith.constant 1.000000e+00 : f32
    %22 = vector.broadcast %cst_22 : f32 to vector<64x4xf32>
    %23 = arith.subf %21, %22 : vector<64x4xf32>
    %24 = arith.select %18, %16, %23 : vector<64x4xi1>, vector<64x4xf32>
    %25 = vector.shape_cast %24 : vector<64x4xf32> to vector<8x8x4xf32>
    %c1 = arith.constant 1 : index
    %c1_23 = arith.constant 1 : index
    %c0_24 = arith.constant 0 : index
    %26 = vector.load %arg9[%c1, %c1_23, %c0_24] : memref<10x10x4xf32, #tpu.memory_space<vmem>>, vector<8x8x4xf32>
    tpu.vector_store %arg9[%c1, %c1_23, %c0_24], %25 {strides = array<i32>} : memref<10x10x4xf32, #tpu.memory_space<vmem>>, vector<8x8x4xf32>,
    %c0_25 = arith.constant 0 : index
    %c0_26 = arith.constant 0 : index
    %c0_27 = arith.constant 0 : index
    %27 = vector.load %arg2[%c0_25, %c0_26, %c0_27] : memref<1x64x8xbf16, #tpu.memory_space<vmem>>, vector<1x64x8xbf16>
    %28 = vector.shape_cast %27 : vector<1x64x8xbf16> to vector<64x8xbf16>
    %29 = arith.extf %28 : vector<64x8xbf16> to vector<64x8xf32>
    %c0_28 = arith.constant 0 : index
    %c0_29 = arith.constant 0 : index
    %30 = vector.load %arg6[%c0_28, %c0_29] : memref<1x8xf32, #tpu.memory_space<vmem>>, vector<1x8xf32>
    %31 = vector.broadcast %30 : vector<1x8xf32> to vector<64x8xf32>
    %32 = arith.addf %29, %31 : vector<64x8xf32>
    %c0_30 = arith.constant 0 : index
    %c0_31 = arith.constant 0 : index
    %c0_32 = arith.constant 0 : index
    %33 = vector.load %arg9[%c0_30, %c0_31, %c0_32] : memref<10x10x4xf32, #tpu.memory_space<vmem>>, vector<8x8x4xf32>
    %34 = vector.shape_cast %33 : vector<8x8x4xf32> to vector<64x4xf32>
    %35 = arith.truncf %34 : vector<64x4xf32> to vector<64x4xbf16>
    %c0_33 = arith.constant 0 : index
    %c0_34 = arith.constant 0 : index
    %c0_35 = arith.constant 0 : index
    %36 = vector.load %arg5[%c0_33, %c0_34, %c0_35] : memref<9x4x8xbf16, #tpu.memory_space<vmem>>, vector<1x4x8xbf16>
    %37 = vector.shape_cast %36 : vector<1x4x8xbf16> to vector<4x8xbf16>
    %cst_36 = arith.constant dense<0.000000e+00> : vector<64x8xf32>
    %38 = tpu.matmul %35, %37, %cst_36 {dimension_numbers = #tpu.dot_dimension_numbers<[1], [0], [0], [1], [0, 0, 1, 1], [], []>} : vector<64x4xbf16>, vector<4x8xbf16>, vector<64x8xf32> -> vector<64x8xf32>
    %39 = arith.addf %32, %38 : vector<64x8xf32>
    %c0_37 = arith.constant 0 : index
    %c1_38 = arith.constant 1 : index
    %c0_39 = arith.constant 0 : index
    %40 = vector.load %arg9[%c0_37, %c1_38, %c0_39] : memref<10x10x4xf32, #tpu.memory_space<vmem>>, vector<8x8x4xf32>
    %41 = vector.shape_cast %40 : vector<8x8x4xf32> to vector<64x4xf32>
    %42 = arith.truncf %41 : vector<64x4xf32> to vector<64x4xbf16>
    %c1_40 = arith.constant 1 : index
    %c0_41 = arith.constant 0 : index
    %c0_42 = arith.constant 0 : index
    %43 = vector.load %arg5[%c1_40, %c0_41, %c0_42] : memref<9x4x8xbf16, #tpu.memory_space<vmem>>, vector<1x4x8xbf16>
    %44 = vector.shape_cast %43 : vector<1x4x8xbf16> to vector<4x8xbf16>
    %cst_43 = arith.constant dense<0.000000e+00> : vector<64x8xf32>
    %45 = tpu.matmul %42, %44, %cst_43 {dimension_numbers = #tpu.dot_dimension_numbers<[1], [0], [0], [1], [0, 0, 1, 1], [], []>} : vector<64x4xbf16>, vector<4x8xbf16>, vector<64x8xf32> -> vector<64x8xf32>
    %46 = arith.addf %39, %45 : vector<64x8xf32>
    %c0_44 = arith.constant 0 : index
    %c2 = arith.constant 2 : index
    %c0_45 = arith.constant 0 : index
    %47 = vector.load %arg9[%c0_44, %c2, %c0_45] : memref<10x10x4xf32, #tpu.memory_space<vmem>>, vector<8x8x4xf32>
    %48 = vector.shape_cast %47 : vector<8x8x4xf32> to vector<64x4xf32>
    %49 = arith.truncf %48 : vector<64x4xf32> to vector<64x4xbf16>
    %c2_46 = arith.constant 2 : index
    %c0_47 = arith.constant 0 : index
    %c0_48 = arith.constant 0 : index
    %50 = vector.load %arg5[%c2_46, %c0_47, %c0_48] : memref<9x4x8xbf16, #tpu.memory_space<vmem>>, vector<1x4x8xbf16>
    %51 = vector.shape_cast %50 : vector<1x4x8xbf16> to vector<4x8xbf16>
    %cst_49 = arith.constant dense<0.000000e+00> : vector<64x8xf32>
    %52 = tpu.matmul %49, %51, %cst_49 {dimension_numbers = #tpu.dot_dimension_numbers<[1], [0], [0], [1], [0, 0, 1, 1], [], []>} : vector<64x4xbf16>, vector<4x8xbf16>, vector<64x8xf32> -> vector<64x8xf32>
    %53 = arith.addf %46, %52 : vector<64x8xf32>
    %c1_50 = arith.constant 1 : index
    %c0_51 = arith.constant 0 : index
    %c0_52 = arith.constant 0 : index
    %54 = vector.load %arg9[%c1_50, %c0_51, %c0_52] : memref<10x10x4xf32, #tpu.memory_space<vmem>>, vector<8x8x4xf32>
    %55 = vector.shape_cast %54 : vector<8x8x4xf32> to vector<64x4xf32>
    %56 = arith.truncf %55 : vector<64x4xf32> to vector<64x4xbf16>
    %c3 = arith.constant 3 : index
    %c0_53 = arith.constant 0 : index
    %c0_54 = arith.constant 0 : index
    %57 = vector.load %arg5[%c3, %c0_53, %c0_54] : memref<9x4x8xbf16, #tpu.memory_space<vmem>>, vector<1x4x8xbf16>
    %58 = vector.shape_cast %57 : vector<1x4x8xbf16> to vector<4x8xbf16>
    %cst_55 = arith.constant dense<0.000000e+00> : vector<64x8xf32>
    %59 = tpu.matmul %56, %58, %cst_55 {dimension_numbers = #tpu.dot_dimension_numbers<[1], [0], [0], [1], [0, 0, 1, 1], [], []>} : vector<64x4xbf16>, vector<4x8xbf16>, vector<64x8xf32> -> vector<64x8xf32>
    %60 = arith.addf %53, %59 : vector<64x8xf32>
    %c1_56 = arith.constant 1 : index
    %c1_57 = arith.constant 1 : index
    %c0_58 = arith.constant 0 : index
    %61 = vector.load %arg9[%c1_56, %c1_57, %c0_58] : memref<10x10x4xf32, #tpu.memory_space<vmem>>, vector<8x8x4xf32>
    %62 = vector.shape_cast %61 : vector<8x8x4xf32> to vector<64x4xf32>
    %63 = arith.truncf %62 : vector<64x4xf32> to vector<64x4xbf16>
    %c4 = arith.constant 4 : index
    %c0_59 = arith.constant 0 : index
    %c0_60 = arith.constant 0 : index
    %64 = vector.load %arg5[%c4, %c0_59, %c0_60] : memref<9x4x8xbf16, #tpu.memory_space<vmem>>, vector<1x4x8xbf16>
    %65 = vector.shape_cast %64 : vector<1x4x8xbf16> to vector<4x8xbf16>
    %cst_61 = arith.constant dense<0.000000e+00> : vector<64x8xf32>
    %66 = tpu.matmul %63, %65, %cst_61 {dimension_numbers = #tpu.dot_dimension_numbers<[1], [0], [0], [1], [0, 0, 1, 1], [], []>} : vector<64x4xbf16>, vector<4x8xbf16>, vector<64x8xf32> -> vector<64x8xf32>
    %67 = arith.addf %60, %66 : vector<64x8xf32>
    %c1_62 = arith.constant 1 : index
    %c2_63 = arith.constant 2 : index
    %c0_64 = arith.constant 0 : index
    %68 = vector.load %arg9[%c1_62, %c2_63, %c0_64] : memref<10x10x4xf32, #tpu.memory_space<vmem>>, vector<8x8x4xf32>
    %69 = vector.shape_cast %68 : vector<8x8x4xf32> to vector<64x4xf32>
    %70 = arith.truncf %69 : vector<64x4xf32> to vector<64x4xbf16>
    %c5 = arith.constant 5 : index
    %c0_65 = arith.constant 0 : index
    %c0_66 = arith.constant 0 : index
    %71 = vector.load %arg5[%c5, %c0_65, %c0_66] : memref<9x4x8xbf16, #tpu.memory_space<vmem>>, vector<1x4x8xbf16>
    %72 = vector.shape_cast %71 : vector<1x4x8xbf16> to vector<4x8xbf16>
    %cst_67 = arith.constant dense<0.000000e+00> : vector<64x8xf32>
    %73 = tpu.matmul %70, %72, %cst_67 {dimension_numbers = #tpu.dot_dimension_numbers<[1], [0], [0], [1], [0, 0, 1, 1], [], []>} : vector<64x4xbf16>, vector<4x8xbf16>, vector<64x8xf32> -> vector<64x8xf32>
    %74 = arith.addf %67, %73 : vector<64x8xf32>
    %c2_68 = arith.constant 2 : index
    %c0_69 = arith.constant 0 : index
    %c0_70 = arith.constant 0 : index
    %75 = vector.load %arg9[%c2_68, %c0_69, %c0_70] : memref<10x10x4xf32, #tpu.memory_space<vmem>>, vector<8x8x4xf32>
    %76 = vector.shape_cast %75 : vector<8x8x4xf32> to vector<64x4xf32>
    %77 = arith.truncf %76 : vector<64x4xf32> to vector<64x4xbf16>
    %c6 = arith.constant 6 : index
    %c0_71 = arith.constant 0 : index
    %c0_72 = arith.constant 0 : index
    %78 = vector.load %arg5[%c6, %c0_71, %c0_72] : memref<9x4x8xbf16, #tpu.memory_space<vmem>>, vector<1x4x8xbf16>
    %79 = vector.shape_cast %78 : vector<1x4x8xbf16> to vector<4x8xbf16>
    %cst_73 = arith.constant dense<0.000000e+00> : vector<64x8xf32>
    %80 = tpu.matmul %77, %79, %cst_73 {dimension_numbers = #tpu.dot_dimension_numbers<[1], [0], [0], [1], [0, 0, 1, 1], [], []>} : vector<64x4xbf16>, vector<4x8xbf16>, vector<64x8xf32> -> vector<64x8xf32>
    %81 = arith.addf %74, %80 : vector<64x8xf32>
    %c2_74 = arith.constant 2 : index
    %c1_75 = arith.constant 1 : index
    %c0_76 = arith.constant 0 : index
    %82 = vector.load %arg9[%c2_74, %c1_75, %c0_76] : memref<10x10x4xf32, #tpu.memory_space<vmem>>, vector<8x8x4xf32>
    %83 = vector.shape_cast %82 : vector<8x8x4xf32> to vector<64x4xf32>
    %84 = arith.truncf %83 : vector<64x4xf32> to vector<64x4xbf16>
    %c7 = arith.constant 7 : index
    %c0_77 = arith.constant 0 : index
    %c0_78 = arith.constant 0 : index
    %85 = vector.load %arg5[%c7, %c0_77, %c0_78] : memref<9x4x8xbf16, #tpu.memory_space<vmem>>, vector<1x4x8xbf16>
    %86 = vector.shape_cast %85 : vector<1x4x8xbf16> to vector<4x8xbf16>
    %cst_79 = arith.constant dense<0.000000e+00> : vector<64x8xf32>
    %87 = tpu.matmul %84, %86, %cst_79 {dimension_numbers = #tpu.dot_dimension_numbers<[1], [0], [0], [1], [0, 0, 1, 1], [], []>} : vector<64x4xbf16>, vector<4x8xbf16>, vector<64x8xf32> -> vector<64x8xf32>
    %88 = arith.addf %81, %87 : vector<64x8xf32>
    %c2_80 = arith.constant 2 : index
    %c2_81 = arith.constant 2 : index
    %c0_82 = arith.constant 0 : index
    %89 = vector.load %arg9[%c2_80, %c2_81, %c0_82] : memref<10x10x4xf32, #tpu.memory_space<vmem>>, vector<8x8x4xf32>
    %90 = vector.shape_cast %89 : vector<8x8x4xf32> to vector<64x4xf32>
    %91 = arith.truncf %90 : vector<64x4xf32> to vector<64x4xbf16>
    %c8 = arith.constant 8 : index
    %c0_83 = arith.constant 0 : index
    %c0_84 = arith.constant 0 : index
    %92 = vector.load %arg5[%c8, %c0_83, %c0_84] : memref<9x4x8xbf16, #tpu.memory_space<vmem>>, vector<1x4x8xbf16>
    %93 = vector.shape_cast %92 : vector<1x4x8xbf16> to vector<4x8xbf16>
    %cst_85 = arith.constant dense<0.000000e+00> : vector<64x8xf32>
    %94 = tpu.matmul %91, %93, %cst_85 {dimension_numbers = #tpu.dot_dimension_numbers<[1], [0], [0], [1], [0, 0, 1, 1], [], []>} : vector<64x4xbf16>, vector<4x8xbf16>, vector<64x8xf32> -> vector<64x8xf32>
    %95 = arith.addf %88, %94 : vector<64x8xf32>
    %96 = arith.truncf %95 : vector<64x8xf32> to vector<64x8xbf16>
    %c0_86 = arith.constant 0 : index
    %c0_87 = arith.constant 0 : index
    %c0_88 = arith.constant 0 : index
    %97 = vector.load %arg7[%c0_86, %c0_87, %c0_88] : memref<1x64x8xbf16, #tpu.memory_space<vmem>>, vector<1x64x8xbf16>
    %98 = vector.shape_cast %97 : vector<1x64x8xbf16> to vector<64x8xbf16>
    %99 = vector.shape_cast %96 : vector<64x8xbf16> to vector<1x64x8xbf16>
    tpu.vector_store %arg7[%c0_86, %c0_87, %c0_88], %99 {strides = array<i32>} : memref<1x64x8xbf16, #tpu.memory_space<vmem>>, vector<1x64x8xbf16>,
    %100 = arith.extf %96 : vector<64x8xbf16> to vector<64x8xf32>
    %cst_89 = arith.constant dense<0.000000e+00> : vector<8xf32>
    %101 = vector.multi_reduction <add>, %100, %cst_89 [0] : vector<64x8xf32> to vector<8xf32>
    %102 = vector.shape_cast %101 : vector<8xf32> to vector<1x8xf32>
    %c0_90 = arith.constant 0 : index
    %c0_91 = arith.constant 0 : index
    %c0_92 = arith.constant 0 : index
    %103 = vector.load %arg8[%c0_90, %c0_91, %c0_92] : memref<1x2x8xf32, #tpu.memory_space<vmem>>, vector<1x1x8xf32>
    %104 = vector.shape_cast %103 : vector<1x1x8xf32> to vector<1x8xf32>
    %105 = vector.shape_cast %102 : vector<1x8xf32> to vector<1x1x8xf32>
    tpu.vector_store %arg8[%c0_90, %c0_91, %c0_92], %105 {strides = array<i32>} : memref<1x2x8xf32, #tpu.memory_space<vmem>>, vector<1x1x8xf32>,
    %106 = arith.mulf %100, %100 : vector<64x8xf32>
    %cst_93 = arith.constant dense<0.000000e+00> : vector<8xf32>
    %107 = vector.multi_reduction <add>, %106, %cst_93 [0] : vector<64x8xf32> to vector<8xf32>
    %108 = vector.shape_cast %107 : vector<8xf32> to vector<1x8xf32>
    %c0_94 = arith.constant 0 : index
    %c1_95 = arith.constant 1 : index
    %c0_96 = arith.constant 0 : index
    %109 = vector.load %arg8[%c0_94, %c1_95, %c0_96] : memref<1x2x8xf32, #tpu.memory_space<vmem>>, vector<1x1x8xf32>
    %110 = vector.shape_cast %109 : vector<1x1x8xf32> to vector<1x8xf32>
    %111 = vector.shape_cast %108 : vector<1x8xf32> to vector<1x1x8xf32>
    tpu.vector_store %arg8[%c0_94, %c1_95, %c0_96], %111 {strides = array<i32>} : memref<1x2x8xf32, #tpu.memory_space<vmem>>, vector<1x1x8xf32>,
    return
  }
  func.func @transform_0(%arg0: i32) -> (i32, i32, i32) {
    %c0_i32 = arith.constant 0 : i32
    %c0_i32_0 = arith.constant 0 : i32
    %c0_i32_1 = arith.constant 0 : i32
    return %arg0, %c0_i32, %c0_i32_0 : i32, i32, i32
  }
  func.func @transform_1(%arg0: i32) -> (i32, i32, i32) {
    %c0_i32 = arith.constant 0 : i32
    %c0_i32_0 = arith.constant 0 : i32
    %c0_i32_1 = arith.constant 0 : i32
    return %arg0, %c0_i32, %c0_i32_0 : i32, i32, i32
  }
  func.func @transform_2(%arg0: i32) -> (i32, i32) {
    %c0_i32 = arith.constant 0 : i32
    %c0_i32_0 = arith.constant 0 : i32
    %c0_i32_1 = arith.constant 0 : i32
    return %c0_i32, %c0_i32_0 : i32, i32
  }
  func.func @transform_3(%arg0: i32) -> (i32, i32) {
    %c0_i32 = arith.constant 0 : i32
    %c0_i32_0 = arith.constant 0 : i32
    %c0_i32_1 = arith.constant 0 : i32
    return %c0_i32, %c0_i32_0 : i32, i32
  }
  func.func @transform_4(%arg0: i32) -> (i32, i32, i32) {
    %c0_i32 = arith.constant 0 : i32
    %c0_i32_0 = arith.constant 0 : i32
    %c0_i32_1 = arith.constant 0 : i32
    %c0_i32_2 = arith.constant 0 : i32
    return %c0_i32, %c0_i32_0, %c0_i32_1 : i32, i32, i32
  }
  func.func @transform_5(%arg0: i32) -> (i32, i32) {
    %c0_i32 = arith.constant 0 : i32
    %c0_i32_0 = arith.constant 0 : i32
    %c0_i32_1 = arith.constant 0 : i32
    return %c0_i32, %c0_i32_0 : i32, i32
  }
  func.func @transform_6(%arg0: i32) -> (i32, i32, i32) {
    %c0_i32 = arith.constant 0 : i32
    %c0_i32_0 = arith.constant 0 : i32
    %c0_i32_1 = arith.constant 0 : i32
    return %arg0, %c0_i32, %c0_i32_0 : i32, i32, i32
  }
  func.func @transform_7(%arg0: i32) -> (i32, i32, i32) {
    %c0_i32 = arith.constant 0 : i32
    %c0_i32_0 = arith.constant 0 : i32
    %c0_i32_1 = arith.constant 0 : i32
    return %arg0, %c0_i32, %c0_i32_0 : i32, i32, i32
  }
}

module attributes {stable_mosaic.version = 11 : i64} {
  func.func @k3(%arg0: i32, %arg1: memref<1x64x8xbf16, #tpu.memory_space<vmem>>, %arg2: memref<1x8xf32, #tpu.memory_space<vmem>>, %arg3: memref<1x8xf32, #tpu.memory_space<vmem>>, %arg4: memref<1x8x64xf32, #tpu.memory_space<vmem>>) attributes {dimension_semantics = [#tpu.dimension_semantics<parallel>], iteration_bounds = array<i64: 2>, scalar_prefetch = 0 : i64, scratch_operands = 0 : i64, tpu.core_type = #tpu.core_type<tc>, window_params = [{transform_indices = @transform_0, window_bounds = array<i64: 1, 64, 8>}, {pipeline_mode = #tpu.pipeline_mode<synchronous>, transform_indices = @transform_1, window_bounds = array<i64: 1, 8>}, {pipeline_mode = #tpu.pipeline_mode<synchronous>, transform_indices = @transform_2, window_bounds = array<i64: 1, 8>}, {transform_indices = @transform_3, window_bounds = array<i64: 1, 8, 64>}]} {
    %c0 = arith.constant 0 : index
    %c0_0 = arith.constant 0 : index
    %c0_1 = arith.constant 0 : index
    %0 = vector.load %arg1[%c0, %c0_0, %c0_1] : memref<1x64x8xbf16, #tpu.memory_space<vmem>>, vector<1x64x8xbf16>
    %1 = vector.shape_cast %0 : vector<1x64x8xbf16> to vector<64x8xbf16>
    %2 = arith.extf %1 : vector<64x8xbf16> to vector<64x8xf32>
    %c0_2 = arith.constant 0 : index
    %c0_3 = arith.constant 0 : index
    %3 = vector.load %arg2[%c0_2, %c0_3] : memref<1x8xf32, #tpu.memory_space<vmem>>, vector<1x8xf32>
    %4 = vector.broadcast %3 : vector<1x8xf32> to vector<64x8xf32>
    %5 = arith.mulf %2, %4 : vector<64x8xf32>
    %c0_4 = arith.constant 0 : index
    %c0_5 = arith.constant 0 : index
    %6 = vector.load %arg3[%c0_4, %c0_5] : memref<1x8xf32, #tpu.memory_space<vmem>>, vector<1x8xf32>
    %7 = vector.broadcast %6 : vector<1x8xf32> to vector<64x8xf32>
    %8 = arith.addf %5, %7 : vector<64x8xf32>
    %cst = arith.constant 0.000000e+00 : f32
    %9 = vector.broadcast %cst : f32 to vector<64x8xf32>
    %10 = arith.cmpf ogt, %8, %9 : vector<64x8xf32>
    %cst_6 = arith.constant 0.000000e+00 : f32
    %11 = vector.broadcast %cst_6 : f32 to vector<64x8xf32>
    %12 = arith.minimumf %8, %11 : vector<64x8xf32>
    %13 = math.exp %12 : vector<64x8xf32>
    %cst_7 = arith.constant 1.000000e+00 : f32
    %14 = vector.broadcast %cst_7 : f32 to vector<64x8xf32>
    %15 = arith.subf %13, %14 : vector<64x8xf32>
    %16 = arith.select %10, %8, %15 : vector<64x8xi1>, vector<64x8xf32>
    %17 = tpu.transpose %16, [1, 0] : vector<64x8xf32> -> vector<8x64xf32>
    %c0_8 = arith.constant 0 : index
    %c0_9 = arith.constant 0 : index
    %c0_10 = arith.constant 0 : index
    %18 = vector.load %arg4[%c0_8, %c0_9, %c0_10] : memref<1x8x64xf32, #tpu.memory_space<vmem>>, vector<1x8x64xf32>
    %19 = vector.shape_cast %18 : vector<1x8x64xf32> to vector<8x64xf32>
    %20 = vector.shape_cast %17 : vector<8x64xf32> to vector<1x8x64xf32>
    tpu.vector_store %arg4[%c0_8, %c0_9, %c0_10], %20 {strides = array<i32>} : memref<1x8x64xf32, #tpu.memory_space<vmem>>, vector<1x8x64xf32>,
    return
  }
  func.func @transform_0(%arg0: i32) -> (i32, i32, i32) {
    %c0_i32 = arith.constant 0 : i32
    %c0_i32_0 = arith.constant 0 : i32
    %c0_i32_1 = arith.constant 0 : i32
    return %arg0, %c0_i32, %c0_i32_0 : i32, i32, i32
  }
  func.func @transform_1(%arg0: i32) -> (i32, i32) {
    %c0_i32 = arith.constant 0 : i32
    %c0_i32_0 = arith.constant 0 : i32
    %c0_i32_1 = arith.constant 0 : i32
    return %c0_i32, %c0_i32_0 : i32, i32
  }
  func.func @transform_2(%arg0: i32) -> (i32, i32) {
    %c0_i32 = arith.constant 0 : i32
    %c0_i32_0 = arith.constant 0 : i32
    %c0_i32_1 = arith.constant 0 : i32
    return %c0_i32, %c0_i32_0 : i32, i32
  }
  func.func @transform_3(%arg0: i32) -> (i32, i32, i32) {
    %c0_i32 = arith.constant 0 : i32
    %c0_i32_0 = arith.constant 0 : i32
    %c0_i32_1 = arith.constant 0 : i32
    return %arg0, %c0_i32, %c0_i32_0 : i32, i32, i32
  }
}

</mosaic_0001>

<bundles_post_ra>
// kernel: res_down_forward.5
= control target key start
LH: loop header
LB: loop body
LE: loop exit
PB: predicated region body
PF: predicated region fallthrough
CT: control target
= control target key end

     0   :  { %s437_s12 = smov 0   ;;  %s490_s0 = inlined_call_operand.vmem [shape: bf16[2,64,8], index: 0, kind: input, shape index: {}]   ;;  %s491_s1 = inlined_call_operand.vmem [shape: f32[1,8], index: 1, kind: input, shape index: {}]   ;;  %s492_s2 = inlined_call_operand.vmem [shape: f32[1,8], index: 2, kind: input, shape index: {}]   ;;  %s493_s3 = inlined_call_operand.vmem [shape: f32[2,8,64], index: 3, kind: output, shape index: {}]  }
   0x1 LB: > { %s344_s13 = sadd.s32 4294967295, %s415_s12   ;;  %p348_p0 = scmp.ge.s32.totalorder %s415_s12, 1  ;;  %s415_s12 = sphi %s437_s12, %s13_s12  }
   0x2   : > { %p137_p1 = scmp.lt.s32.totalorder %s415_s12, 3 }
   0x4   : > { %p138_p2 = pnand %p348_p0, %p137_p1 }
   0x5   : > { %p160_p3 = scmp.lt.s32.totalorder (!%p138_p2), %s344_s13, 1 }
   0x6   : > { %141 = sbr.rel (%p138_p2) target bundleno = 201 (0xc9), region = 32 }
   0xb   : > { %s495_s13 = smov (!%p160_p3, %s344_s13), 1  ;;  %v456_v0 = vld [vmem:[%s491_s1] ss:$0 sm:$0xff]  ;;  %vm289_vm8 = vcmask 523264  }
   0xc   : > { %s362_s14 = sshll.u32 %s495_s13, 5  ;;  %v463_v4 = vld [vmem:[%s492_s2] ss:$0 sm:$0xff]  ;;  %s351_s22 = sshll.u32 %s495_s13, 3 }
   0xd   : > { %s451_s17 = scalar_lea.vmem %s490_s0, %s362_s14  ;;  %s168_s25 = scalar_lea.vmem %s493_s3, %s351_s22 }
   0xe   : > { %v364_v1 = vld [vmem:[%s451_s17] sm:$0xff]   ;;  %v379_v2 = vld [vmem:[%s451_s17 + $0x8] sm:$0xff]   ;;  %v380_v20 = vld [vmem:[%s451_s17 + $0x10] sm:$0xff]  }
   0xf   : > { %v365_v3 = vunpack.c.l.bf16 %v364_v1  ;;  %v366_v5 = vunpack.c.h.bf16 %v364_v1  ;;  %v369_v6 = vunpack.c.l.bf16 %v379_v2  ;;  %v370_v17 = vunpack.c.h.bf16 %v379_v2  ;;  %v381_v39 = vld [vmem:[%s451_s17 + $0x18] sm:$0xff]  }
  0x10   : > { %v373_v24 = vunpack.c.l.bf16 %v380_v20  ;;  %v374_v33 = vunpack.c.h.bf16 %v380_v20  ;;  %v377_v42 = vunpack.c.l.bf16 %v381_v39  ;;  %v378_v50 = vunpack.c.h.bf16 %v381_v39 }
  0x11   : > { %v189_v7 = vmul.f32 %v456_v0, %v365_v3  ;;  %v190_v8 = vmul.f32 %v456_v0, %v366_v5  ;;  %v191_v11 = vmul.f32 %v456_v0, %v369_v6  ;;  %v192_v19 = vmul.f32 %v456_v0, %v370_v17 }
  0x12   : > { %v193_v29 = vmul.f32 %v456_v0, %v373_v24  ;;  %v194_v37 = vmul.f32 %v456_v0, %v374_v33  ;;  %v195_v46 = vmul.f32 %v456_v0, %v377_v42  ;;  %v196_v54 = vmul.f32 %v456_v0, %v378_v50 }
  0x13   : > { %v201_v9 = vadd.f32 %v463_v4, %v189_v7  ;;  %v202_v10 = vadd.f32 %v463_v4, %v190_v8  ;;  %v203_v16 = vadd.f32 %v463_v4, %v191_v11  ;;  %v204_v23 = vadd.f32 %v463_v4, %v192_v19 }
  0x14   : > { %v205_v32 = vadd.f32 %v463_v4, %v193_v29  ;;  %v206_v41 = vadd.f32 %v463_v4, %v194_v37  ;;  %v207_v49 = vadd.f32 %v463_v4, %v195_v46  ;;  %v208_v57 = vadd.f32 %v463_v4, %v196_v54 }
  0x15   : > { %v217_v12 = vmin.f32 %v201_v9, 0.0  ;;  %v218_v13 = vmin.f32 %v202_v10, 0.0  ;;  %v219_v18 = vmin.f32 %v203_v16, 0.0  ;;  %vm209_vm0 = vcmp.gt.f32.partialorder %v201_v9, 0.0 }
  0x16   : > { %v220_v28 = vmin.f32 %v204_v23, 0.0  ;;  %vm210_vm1 = vcmp.gt.f32.partialorder %v202_v10, 0.0  ;;  %v221_v36 = vmin.f32 %v205_v32, 0.0  ;;  %vm211_vm2 = vcmp.gt.f32.partialorder %v203_v16, 0.0 }
  0x17   : > { %v225_v14 = vmul.f32 1.442695, %v217_v12  ;;  %v227_v15 = vmul.f32 1.442695, %v218_v13  ;;  %v229_v22 = vmul.f32 1.442695, %v219_v18 }
  0x18   : > { %v231_v31 = vmul.f32 1.442695, %v220_v28  ;;  %v233_v40 = vmul.f32 1.442695, %v221_v36  ;;  %v222_v45 = vmin.f32 %v206_v41, 0.0  ;;  %vm212_vm3 = vcmp.gt.f32.partialorder %v204_v23, 0.0 }
  0x19   : > { %393 = vpow2.f32 %v225_v14  ;;  %v223_v53 = vmin.f32 %v207_v49, 0.0  ;;  %vm213_vm4 = vcmp.gt.f32.partialorder %v205_v32, 0.0  ;;  %v224_v60 = vmin.f32 %v208_v57, 0.0 }
  0x1a   : > { %395 = vpow2.f32 %v227_v15  ;;  %v235_v48 = vmul.f32 1.442695, %v222_v45  ;;  %vm214_vm5 = vcmp.gt.f32.partialorder %v206_v41, 0.0  ;;  %vm215_vm6 = vcmp.gt.f32.partialorder %v207_v49, 0.0 }
  0x1b   : > { %397 = vpow2.f32 %v229_v22  ;;  %v237_v56 = vmul.f32 1.442695, %v223_v53  ;;  %v239_v62 = vmul.f32 1.442695, %v224_v60  ;;  %vm216_vm7 = vcmp.gt.f32.partialorder %v208_v57, 0.0 }
  0x1c   : > { %399 = vpow2.f32 %v231_v31 }
  0x1d   : > { %401 = vpow2.f32 %v233_v40 }
  0x1e   : > { %403 = vpow2.f32 %v235_v48 }
  0x1f   : > { %v394_v21 = vpop.eup %393  ;;  %405 = vpow2.f32 %v237_v56 }
  0x20   : > { %v352_v25 = vadd.f32 -1.0, %v394_v21  ;;  %v396_v26 = vpop.eup %395  ;;  %407 = vpow2.f32 %v239_v62 }
  0x21   : > { %v353_v30 = vadd.f32 -1.0, %v396_v26  ;;  %v398_v35 = vpop.eup %397 }
  0x22   : > { %v249_v27 = vsel %vm209_vm0, %v201_v9, %v352_v25  ;;  %v354_v38 = vadd.f32 -1.0, %v398_v35  ;;  %v400_v44 = vpop.eup %399 }
  0x23   : > { %257 = vxpose.xlu0.b32.start [1/8] (short) (narrow) %v249_v27, 8  ;;  %v250_v34 = vsel %vm210_vm1, %v202_v10, %v353_v30  ;;  %v355_v47 = vadd.f32 -1.0, %v400_v44  ;;  %v402_v52 = vpop.eup %401 }
  0x24   : > { %v251_v43 = vsel %vm211_vm2, %v203_v16, %v354_v38  ;;  %v356_v55 = vadd.f32 -1.0, %v402_v52  ;;  %v404_v59 = vpop.eup %403 }
  0x25   : > { %v252_v51 = vsel %vm212_vm3, %v204_v23, %v355_v47  ;;  %v357_v61 = vadd.f32 -1.0, %v404_v59  ;;  %v406_v1 = vpop.eup %405 }
  0x26   : > { %v253_v58 = vsel %vm213_vm4, %v205_v32, %v356_v55  ;;  %v358_v2 = vadd.f32 -1.0, %v406_v1  ;;  %v408_v3 = vpop.eup %407 }
  0x27   : > { %v254_v63 = vsel %vm214_vm5, %v206_v41, %v357_v61  ;;  %v359_v5 = vadd.f32 -1.0, %v408_v3 }
  0x28   : > { %v255_v0 = vsel %vm215_vm6, %v207_v49, %v358_v2 }
  0x29   : > { %v256_v4 = vsel %vm216_vm7, %v208_v57, %v359_v5 }
  0x2b   : > { %258 = vxpose.xlu0.b32.cont [2/8] (short) (narrow) %v250_v34, 8 }
  0x33   : > { %259 = vxpose.xlu0.b32.cont [3/8] (short) (narrow) %v251_v43, 8 }
  0x3b   : > { %260 = vxpose.xlu0.b32.cont [4/8] (short) (narrow) %v252_v51, 8 }
  0x43   : > { %261 = vxpose.xlu0.b32.cont [5/8] (short) (narrow) %v253_v58, 8 }
  0x4b   : > { %262 = vxpose.xlu0.b32.cont [6/8] (short) (narrow) %v254_v63, 8 }
  0x53   : > { %263 = vxpose.xlu0.b32.cont [7/8] (short) (narrow) %v255_v0, 8 }
  0x5b   : > { %264 = vxpose.xlu0.b32.end [8/8] (short) (narrow) %v256_v4, 8 }
  0xc7   : > { %v273_v6 = vpop.trf.xlu0 }
  0xc8   : > { %290 = vst.msk [vmem:[%s168_s25] sm:$0xff] %vm289_vm8, %v273_v6 }
  0xc9 PF: > { %s13_s12 = sadd.s32 1, %s415_s12  }
  0xca   : > { %p10_p4 = scmp.ge.s32.totalorder %s13_s12, 4  }
  0xcc   :  { %12 = sbr.rel (!%p10_p4) target bundleno = 1 (0x1), region = 62 }

// kernel: res_down_forward.3
= control target key start
LH: loop header
LB: loop body
LE: loop exit
PB: predicated region body
PF: predicated region fallthrough
CT: control target
= control target key end

     0   :  { %s1265_s18 = smov 0   ;;  %s1608_s0 = inlined_call_operand.vmem [shape: f32[8,9,9,4], index: 0, kind: input, shape index: {}]   ;;  %s1609_s1 = inlined_call_operand.vmem [shape: bf16[9,4,12], index: 1, kind: input, shape index: {}]   ;;  %s1610_s2 = inlined_call_operand.vmem [shape: f32[1,12], index: 2, kind: input, shape index: {}]   ;;  %s1611_s3 = inlined_call_operand.vmem [shape: bf16[2,64,4], index: 3, kind: output, shape index: {0}]   ;;  %s1612_s4 = inlined_call_operand.vmem [shape: bf16[2,64,8], index: 4, kind: output, shape index: {1}]   ;;  %s1613_s5 = inlined_call_operand.vmem [shape: f32[2,2,4], index: 5, kind: output, shape index: {2}]  }
   0x1 LB: > { %s1271_s19 = sadd.s32 4294967295, %s1232_s18   ;;  %p1100_p0 = scmp.ge.s32.totalorder %s1232_s18, 1  ;;  %s1232_s18 = sphi %s1265_s18, %s16_s18  }
   0x2   : > { %p194_p1 = scmp.lt.s32.totalorder %s1232_s18, 3 }
   0x4   : > { %p195_p2 = pnand %p1100_p0, %p194_p1 }
   0x5   : > { %s1101_s22 = sshll.u32 (!%p195_p2), %s1271_s19, 2  ;;  %p239_p4 = scmp.lt.s32.totalorder (!%p195_p2), %s1271_s19, 1 }
   0x6   : > { %198 = sbr.rel (%p195_p2) target bundleno = 412 (0x19c), region = 32  ;;  %p233_p3 = scmp.lt.s32.totalorder (!%p195_p2), %s1101_s22, 7 }
   0x7   : > { %s1234_s26 = smov (!%p195_p2), 124  }
   0xb   : > { %v270_v0 = vld [vmem:[%s1609_s1] sm:$0x3]  ;;  %vm284_vm0 = vcmask 1041408   ;;  %v1125_v2 = vld [vmem:[%s1609_s1 + $0x4] sm:$0x3]  ;;  %s1615_s22 = smov (!%p233_p3, %s1101_s22), 7 }
   0xc   : > { %v286_v1 = vsel %vm284_vm0, %v270_v0, 0  ;;  %v1138_v3 = vld [vmem:[%s1609_s1 + $0x6] sm:$0x3]  ;;  %v419_v4 = vsel %vm284_vm0, %v1125_v2, 0  ;;  %v1120_v6 = vld [vmem:[%s1609_s1 + $0x2] sm:$0x3] }
   0xd   : > { %1212 = vmatpush.bf16.msra.mxu1 %v286_v1  ;;  %1213 = vmatpush.bf16.msra.mxu2 %v286_v1  ;;  %v486_v5 = vsel %vm284_vm0, %v1138_v3, 0  ;;  %v1151_v7 = vld [vmem:[%s1609_s1 + $0x8] sm:$0x3]  ;;  %v353_v8 = vsel %vm284_vm0, %v1120_v6, 0  ;;  %s1215_s6 = smul.u32 144, %s1615_s22  ;;  %vm271_vm1 = vcmask 31744  }
   0xe   : > { %1214 = vmatpush.bf16.msra.mxu3 %v286_v1  ;;  %295 = vmatpush.bf16.msra.mxu0 %v286_v1  ;;  %v553_v9 = vsel %vm284_vm0, %v1151_v7, 0  ;;  %v1177_v10 = vld [vmem:[%s1609_s1 + $0xc] sm:$0x3]  ;;  %v1190_v11 = vld [vmem:[%s1609_s1 + $0xe] sm:$0x3]  ;;  %s1617_s19 = smov (!%p239_p4, %s1271_s19), 1 }
   0xf   : > { %s1302_s11 = scalar_lea.vmem %s1608_s0, %s1215_s6  ;;  %v1164_v12 = vld [vmem:[%s1609_s1 + $0xa] sm:$0x3]  ;;  %v1203_v13 = vld [vmem:[%s1609_s1 + $0x10] sm:$0x3]  ;;  %v686_v25 = vsel %vm284_vm0, %v1177_v10, 0  ;;  %v753_v27 = vsel %vm284_vm0, %v1190_v11, 0 }
  0x10   : > { %v1314_v14 = vld [vmem:[%s1302_s11 + $0x20] sm:$0xff]  ;;  %v1317_v15 = vld [vmem:[%s1302_s11 + $0x30] sm:$0xff]  ;;  %v619_v28 = vsel %vm284_vm0, %v1164_v12, 0  ;;  %v819_v29 = vsel %vm284_vm0, %v1203_v13, 0  ;;  %s1210_s22 = sshll.u32 %s1617_s19, 5  ;;  %vm866_vm2 = vcmask 27648  }
  0x11   : > { %428 = vmatpush.bf16.msrb.mxu2 %v419_v4  ;;  %362 = vmatpush.bf16.msrb.mxu1 %v353_v8  ;;  %v1320_v16 = vld [vmem:[%s1302_s11 + $0x40] sm:$0xff]  ;;  %v267_v17 = vpack.c.bf16 %v1317_v15, %v1314_v14  ;;  %v1325_v18 = vld [vmem:[%s1302_s11 + $0x50] sm:$0xff]  ;;  %s1517_s25 = scalar_lea.vmem %s1611_s3, %s1210_s22  ;;  %s1107_s27 = sshll.u32 %s1617_s19, 1  ;;  %vm945_vm3 = vcmask 24576   ;;  %vm907_vm4 = vcmask 60416  }
  0x12   : > { %495 = vmatpush.bf16.msrb.mxu3 %v486_v5  ;;  %562 = vmatpush.bf16.msrb.mxu0 %v553_v9  ;;  %v1328_v19 = vld [vmem:[%s1302_s11 + $0x60] sm:$0xff]  ;;  %v1331_v20 = vld [vmem:[%s1302_s11 + $0x70] sm:$0xff]  ;;  %v268_v21 = vpack.c.bf16 %v1325_v18, %v1320_v16  ;;  %s252_s30 = scalar_lea.vmem %s1613_s5, %s1107_s27  ;;  %s248_s8 = scalar_lea.vmem %s1612_s4, %s1210_s22 }
  0x13   : > { %v269_v22 = vpack.c.bf16 %v1331_v20, %v1328_v19  ;;  %v258_v23 = vld [vmem:[%s1302_s11] sm:$0xff]  ;;  %v1339_v24 = vld [vmem:[%s1302_s11 + $0x10] sm:$0xff]  ;;  %1109 = vmatmul.msk.bf16.vlgmr.msra.gmra.mxu1 %vm271_vm1, %v267_v17 }
  0x14   : > { %v266_v26 = vpack.c.bf16 %v1339_v24, %v258_v23  ;;  %1110 = vmatmul.msk.bf16.vlgmr.msra.gmra.mxu2 %vm271_vm1, %v268_v21  ;;  %v1112_v30 = vld [vmem:[%s1302_s11 + $0x90] sm:$0xff]  ;;  %v1352_v31 = vld [vmem:[%s1302_s11 + $0xa0] sm:$0xff]  ;;  %v667_v2 = vpack.c.bf16 %v1314_v14, %v1339_v24 }
  0x15   : > { %1111 = vmatmul.msk.bf16.vlgmr.msra.gmra.mxu3 %vm271_vm1, %v269_v22  ;;  %695 = vmatpush.bf16.msra.mxu2 %v686_v25  ;;  %v392_v32 = vld [vmem:[%s1302_s11 + $0x1] sm:$0xff]  ;;  %v1356_v33 = vld [vmem:[%s1302_s11 + $0x11] sm:$0xff]  ;;  %v334_v38 = vpack.c.bf16 %v1352_v31, %v1112_v30 }
  0x16   : > { %1108 = vmatmul.msk.bf16.vlgmr.msra.gmra.mxu0 %vm271_vm1, %v266_v26  ;;  %762 = vmatpush.bf16.msra.mxu3 %v753_v27  ;;  %v1130_v34 = vld [vmem:[%s1302_s11 + $0x120] sm:$0xff]  ;;  %v1131_v35 = vld [vmem:[%s1302_s11 + $0x130] sm:$0xff]  ;;  %v400_v39 = vpack.c.bf16 %v1356_v33, %v392_v32 }
  0x17   : > { %628 = vmatpush.bf16.msra.mxu1 %v619_v28  ;;  %828 = vmatpush.bf16.msra.mxu0 %v819_v29  ;;  %v1143_v36 = vld [vmem:[%s1302_s11 + $0x1b0] sm:$0xff]  ;;  %v1144_v37 = vld [vmem:[%s1302_s11 + $0x1c0] sm:$0xff]  ;;  %v467_v40 = vpack.c.bf16 %v1131_v35, %v1130_v34  ;;  %v668_v28 = vpack.c.bf16 %v1320_v16, %v1317_v15  ;;  %v669_v16 = vpack.c.bf16 %v1328_v19, %v1325_v18 }
  0x18   : > { %v534_v41 = vpack.c.bf16 %v1144_v37, %v1143_v36  ;;  %v1114_v42 = vld [vmem:[%s1302_s11 + $0xb0] sm:$0xff]  ;;  %v1370_v43 = vld [vmem:[%s1302_s11 + $0xc0] sm:$0xff] }
  0x19   : > { %v394_v44 = vld [vmem:[%s1302_s11 + $0x21] sm:$0xff]  ;;  %v1374_v45 = vld [vmem:[%s1302_s11 + $0x31] sm:$0xff]  ;;  %v335_v50 = vpack.c.bf16 %v1370_v43, %v1114_v42  ;;  %v734_v23 = vpack.c.bf16 %v1114_v42, %v1352_v31 }
  0x1a   : > { %v1132_v46 = vld [vmem:[%s1302_s11 + $0x140] sm:$0xff]  ;;  %v1133_v47 = vld [vmem:[%s1302_s11 + $0x150] sm:$0xff]  ;;  %v401_v51 = vpack.c.bf16 %v1374_v45, %v394_v44  ;;  %v800_v24 = vpack.c.bf16 %v394_v44, %v1356_v33 }
  0x1b   : > { %v1145_v48 = vld [vmem:[%s1302_s11 + $0x1d0] sm:$0xff]  ;;  %v1146_v49 = vld [vmem:[%s1302_s11 + $0x1e0] sm:$0xff]  ;;  %v468_v52 = vpack.c.bf16 %v1133_v47, %v1132_v46 }
  0x1c   : > { %v535_v53 = vpack.c.bf16 %v1146_v49, %v1145_v48  ;;  %v1116_v54 = vld [vmem:[%s1302_s11 + $0xd0] sm:$0xff]  ;;  %v1117_v55 = vld [vmem:[%s1302_s11 + $0xe0] sm:$0xff] }
  0x1d   : > { %v396_v56 = vld [vmem:[%s1302_s11 + $0x41] sm:$0xff]  ;;  %v397_v57 = vld [vmem:[%s1302_s11 + $0x51] sm:$0xff]  ;;  %v336_v62 = vpack.c.bf16 %v1117_v55, %v1116_v54  ;;  %v735_v29 = vpack.c.bf16 %v1116_v54, %v1370_v43 }
  0x1e   : > { %v1134_v58 = vld [vmem:[%s1302_s11 + $0x160] sm:$0xff]  ;;  %v1135_v59 = vld [vmem:[%s1302_s11 + $0x170] sm:$0xff]  ;;  %v402_v63 = vpack.c.bf16 %v397_v57, %v396_v56  ;;  %v801_v30 = vpack.c.bf16 %v396_v56, %v1374_v45 }
  0x1f   : > { %v1147_v60 = vld [vmem:[%s1302_s11 + $0x1f0] sm:$0xff]  ;;  %v1148_v61 = vld [vmem:[%s1302_s11 + $0x200] sm:$0xff]  ;;  %v469_v0 = vpack.c.bf16 %v1135_v59, %v1134_v58 }
  0x20   : > { %v536_v1 = vpack.c.bf16 %v1148_v61, %v1147_v60  ;;  %v1118_v3 = vld [vmem:[%s1302_s11 + $0xf0] sm:$0xff]  ;;  %v1119_v4 = vld [vmem:[%s1302_s11 + $0x100] sm:$0xff] }
  0x21   : > { %v398_v5 = vld [vmem:[%s1302_s11 + $0x61] sm:$0xff]  ;;  %v399_v6 = vld [vmem:[%s1302_s11 + $0x71] sm:$0xff]  ;;  %v337_v11 = vpack.c.bf16 %v1119_v4, %v1118_v3  ;;  %v736_v33 = vpack.c.bf16 %v1118_v3, %v1117_v55 }
  0x22   : > { %v1136_v7 = vld [vmem:[%s1302_s11 + $0x180] sm:$0xff]  ;;  %v1137_v8 = vld [vmem:[%s1302_s11 + $0x190] sm:$0xff]  ;;  %v403_v12 = vpack.c.bf16 %v399_v6, %v398_v5  ;;  %v802_v34 = vpack.c.bf16 %v398_v5, %v397_v57 }
  0x23   : > { %1121 = vmatmul.msk.bf16.vlgmr.msrb.gmra.mxu1 %vm271_vm1, %v334_v38  ;;  %v1149_v9 = vld [vmem:[%s1302_s11 + $0x210] sm:$0xff]  ;;  %v1150_v10 = vld [vmem:[%s1302_s11 + $0x220] sm:$0xff]  ;;  %v470_v13 = vpack.c.bf16 %v1137_v8, %v1136_v7 }
  0x24   : > { %1126 = vmatmul.msk.bf16.vlgmr.msrb.gmra.mxu2 %vm271_vm1, %v400_v39  ;;  %v537_v14 = vpack.c.bf16 %v1150_v10, %v1149_v9  ;;  %v1156_v17 = vld [vmem:[%s1302_s11 + $0x121] sm:$0xff]  ;;  %v1157_v21 = vld [vmem:[%s1302_s11 + $0x131] sm:$0xff] }
  0x25   : > { %1139 = vmatmul.msk.bf16.vlgmr.msrb.gmra.mxu3 %vm271_vm1, %v467_v40  ;;  %v600_v22 = vpack.c.bf16 %v1157_v21, %v1156_v17  ;;  %v1158_v25 = vld [vmem:[%s1302_s11 + $0x141] sm:$0xff]  ;;  %v1159_v26 = vld [vmem:[%s1302_s11 + $0x151] sm:$0xff] }
  0x26   : > { %1152 = vmatmul.msk.bf16.vlgmr.msrb.gmra.mxu0 %vm271_vm1, %v534_v41  ;;  %v601_v27 = vpack.c.bf16 %v1159_v26, %v1158_v25  ;;  %v1160_v31 = vld [vmem:[%s1302_s11 + $0x161] sm:$0xff]  ;;  %v1161_v32 = vld [vmem:[%s1302_s11 + $0x171] sm:$0xff] }
  0x27   : > { %v602_v15 = vpack.c.bf16 %v1161_v32, %v1160_v31  ;;  %v1162_v35 = vld [vmem:[%s1302_s11 + $0x181] sm:$0xff]  ;;  %v1163_v36 = vld [vmem:[%s1302_s11 + $0x191] sm:$0xff] }
  0x28   : > { %v1176_v37 = vld [vmem:[%s1302_s11 + $0x80] sm:$0xff]  ;;  %v1189_v38 = vld [vmem:[%s1302_s11 + $0x110] sm:$0xff]  ;;  %v603_v40 = vpack.c.bf16 %v1163_v36, %v1162_v35 }
  0x29   : > { %v1202_v39 = vld [vmem:[%s1302_s11 + $0x81] sm:$0xff]  ;;  %v670_v18 = vpack.c.bf16 %v1176_v37, %v1331_v20  ;;  %v737_v19 = vpack.c.bf16 %v1189_v38, %v1119_v4 }
  0x2a   : > { %v803_v42 = vpack.c.bf16 %v1202_v39, %v399_v6 }
  0x33   : > { %1122 = vmatmul.msk.bf16.gmra.mxu1 %vm271_vm1, %v335_v50 }
  0x34   : > { %1127 = vmatmul.msk.bf16.gmra.mxu2 %vm271_vm1, %v401_v51 }
  0x35   : > { %1140 = vmatmul.msk.bf16.gmra.mxu3 %vm271_vm1, %v468_v52 }
  0x36   : > { %1153 = vmatmul.msk.bf16.gmra.mxu0 %vm271_vm1, %v535_v53 }
  0x43   : > { %1123 = vmatmul.msk.bf16.gmra.mxu1 %vm271_vm1, %v336_v62 }
  0x44   : > { %1128 = vmatmul.msk.bf16.gmra.mxu2 %vm271_vm1, %v402_v63 }
  0x45   : > { %1141 = vmatmul.msk.bf16.gmra.mxu3 %vm271_vm1, %v469_v0 }
  0x46   : > { %1154 = vmatmul.msk.bf16.gmra.mxu0 %vm271_vm1, %v536_v1 }
  0x53   : > { %1124 = vmatmul.msk.bf16.gmra.mxu1 %vm271_vm1, %v337_v11  ;;  %v1489_v11 = vld [vmem:[%s1610_s2] ss:$0 sm:$0xff] }
  0x54   : > { %1129 = vmatmul.msk.bf16.gmra.mxu2 %vm271_vm1, %v403_v12 }
  0x55   : > { %1142 = vmatmul.msk.bf16.gmra.mxu3 %vm271_vm1, %v470_v13 }
  0x56   : > { %1155 = vmatmul.msk.bf16.gmra.mxu0 %vm271_vm1, %v537_v14 }
  0x63   : > { %1165 = vmatmul.msk.bf16.vlgmr.msra.gmra.mxu1 %vm271_vm1, %v600_v22 }
  0x64   : > { %1178 = vmatmul.msk.bf16.vlgmr.msra.gmra.mxu2 %vm271_vm1, %v667_v2 }
  0x65   : > { %1191 = vmatmul.msk.bf16.vlgmr.msra.gmra.mxu3 %vm271_vm1, %v734_v23 }
  0x66   : > { %1204 = vmatmul.msk.bf16.vlgmr.msra.gmra.mxu0 %vm271_vm1, %v800_v24 }
  0x73   : > { %1166 = vmatmul.msk.bf16.gmra.mxu1 %vm271_vm1, %v601_v27 }
  0x74   : > { %1179 = vmatmul.msk.bf16.gmra.mxu2 %vm271_vm1, %v668_v28 }
  0x75   : > { %1192 = vmatmul.msk.bf16.gmra.mxu3 %vm271_vm1, %v735_v29 }
  0x76   : > { %1205 = vmatmul.msk.bf16.gmra.mxu0 %vm271_vm1, %v801_v30 }
  0x83   : > { %1167 = vmatmul.msk.bf16.gmra.mxu1 %vm271_vm1, %v602_v15 }
  0x84   : > { %1180 = vmatmul.msk.bf16.gmra.mxu2 %vm271_vm1, %v669_v16 }
  0x85   : > { %1193 = vmatmul.msk.bf16.gmra.mxu3 %vm271_vm1, %v736_v33 }
  0x86   : > { %1206 = vmatmul.msk.bf16.gmra.mxu0 %vm271_vm1, %v802_v34 }
  0x90   : > { %v1443_v41 = vpop.f32.mrf.mxu1 }
  0x91   : > { %v319_v34 = vadd.f32 %v1489_v11, %v1443_v41 }
  0x93   : > { %v297_v43 = vpop.f32.mrf.mxu0  ;;  %1168 = vmatmul.msk.bf16.gmra.mxu1 %vm271_vm1, %v603_v40 }
  0x94   : > { %1181 = vmatmul.msk.bf16.gmra.mxu2 %vm271_vm1, %v670_v18  ;;  %v317_v14 = vadd.f32 %v1489_v11, %v297_v43 }
  0x95   : > { %1194 = vmatmul.msk.bf16.gmra.mxu3 %vm271_vm1, %v737_v19 }
  0x96   : > { %1207 = vmatmul.msk.bf16.gmra.mxu0 %vm271_vm1, %v803_v42 }
  0x97   : > { %v1450_v44 = vpop.f32.mrf.mxu2 }
  0x98   : > { %v1452_v45 = vpop.f32.mrf.mxu3  ;;  %v1454_v46 = vpop.f32.mrf.mxu1 }
  0x9b   : > { %v299_v47 = vpop.f32.mrf.mxu0 }
  0x9c   : > { %v318_v26 = vadd.f32 %v1489_v11, %v299_v47  ;;  %v320_v47 = vadd.f32 %v1489_v11, %v1454_v46 }
  0x9f   : > { %v1456_v48 = vpop.f32.mrf.mxu2 }
  0xa0   : > { %v1458_v20 = vpop.f32.mrf.mxu3  ;;  %v364_v49 = vpop.f32.mrf.mxu1 }
  0xa1   : > { %v384_v21 = vadd.f32 %v364_v49, %v317_v14 }
  0xa3   : > { %v564_v50 = vpop.f32.mrf.mxu0 }
  0xa7   : > { %v430_v51 = vpop.f32.mrf.mxu2 }
  0xa8   : > { %v497_v52 = vpop.f32.mrf.mxu3  ;;  %v366_v53 = vpop.f32.mrf.mxu1  ;;  %v450_v23 = vadd.f32 %v430_v51, %v384_v21 }
  0xa9   : > { %v385_v29 = vadd.f32 %v366_v53, %v318_v26 }
  0xaa   : > { %v517_v27 = vadd.f32 %v497_v52, %v450_v23 }
  0xab   : > { %v566_v54 = vpop.f32.mrf.mxu0 }
  0xac   : > { %v584_v32 = vadd.f32 %v564_v50, %v517_v27 }
  0xaf   : > { %v432_v55 = vpop.f32.mrf.mxu2 }
  0xb0   : > { %v499_v56 = vpop.f32.mrf.mxu3  ;;  %v369_v57 = vpop.f32.mrf.mxu1  ;;  %v451_v31 = vadd.f32 %v432_v55, %v385_v29 }
  0xb1   : > { %v386_v38 = vadd.f32 %v369_v57, %v319_v34 }
  0xb2   : > { %v518_v35 = vadd.f32 %v499_v56, %v451_v31 }
  0xb3   : > { %v1460_v58 = vpop.f32.mrf.mxu0 }
  0xb4   : > { %v585_v42 = vadd.f32 %v566_v54, %v518_v35 }
  0xb7   : > { %v435_v59 = vpop.f32.mrf.mxu2 }
  0xb8   : > { %v502_v60 = vpop.f32.mrf.mxu3  ;;  %v371_v61 = vpop.f32.mrf.mxu1  ;;  %v452_v18 = vadd.f32 %v435_v59, %v386_v38 }
  0xb9   : > { %v387_v54 = vadd.f32 %v371_v61, %v320_v47 }
  0xba   : > { %v519_v51 = vadd.f32 %v502_v60, %v452_v18  ;;  %v321_v60 = vadd.f32 %v1489_v11, %v1450_v44 }
  0xbb   : > { %v1462_v62 = vpop.f32.mrf.mxu0 }
  0xbc   : > { %v586_v21 = vadd.f32 %v1460_v58, %v519_v51 }
  0xbf   : > { %v437_v63 = vpop.f32.mrf.mxu2 }
  0xc0   : > { %v1464_v0 = vpop.f32.mrf.mxu3  ;;  %v1466_v1 = vpop.f32.mrf.mxu1  ;;  %v453_v57 = vadd.f32 %v437_v63, %v387_v54 }
  0xc1   : > { %v388_v31 = vadd.f32 %v1466_v1, %v321_v60 }
  0xc2   : > { %v520_v26 = vadd.f32 %v1464_v0, %v453_v57 }
  0xc3   : > { %v1468_v2 = vpop.f32.mrf.mxu0 }
  0xc7   : > { %v1470_v3 = vpop.f32.mrf.mxu2 }
  0xc8   : > { %v1472_v4 = vpop.f32.mrf.mxu3  ;;  %v1474_v5 = vpop.f32.mrf.mxu1  ;;  %v454_v34 = vadd.f32 %v1470_v3, %v388_v31 }
  0xcb   : > { %v1476_v6 = vpop.f32.mrf.mxu0 }
  0xcf   : > { %v1478_v7 = vpop.f32.mrf.mxu2 }
  0xd0   : > { %v1480_v8 = vpop.f32.mrf.mxu3  ;;  %v1482_v9 = vpop.f32.mrf.mxu1 }
  0xd3   : > { %v1484_v10 = vpop.f32.mrf.mxu0 }
  0xd7   : > { %v1491_v12 = vpop.f32.mrf.mxu2 }
  0xd8   : > { %v1493_v13 = vpop.f32.mrf.mxu3  ;;  %v1496_v17 = vpop.f32.mrf.mxu1 }
  0xdb   : > { %v1498_v22 = vpop.f32.mrf.mxu0 }
  0xdf   : > { %v1500_v24 = vpop.f32.mrf.mxu2 }
  0xe0   : > { %v1502_v25 = vpop.f32.mrf.mxu3  ;;  %v630_v28 = vpop.f32.mrf.mxu1 }
  0xe1   : > { %v650_v15 = vadd.f32 %v630_v28, %v584_v32 }
  0xe3   : > { %v830_v30 = vpop.f32.mrf.mxu0 }
  0xe7   : > { %v697_v16 = vpop.f32.mrf.mxu2 }
  0xe8   : > { %v764_v33 = vpop.f32.mrf.mxu3  ;;  %v717_v36 = vadd.f32 %v697_v16, %v650_v15  ;;  %v632_v37 = vpop.f32.mrf.mxu1 }
  0xe9   : > { %v651_v41 = vadd.f32 %v632_v37, %v585_v42  ;;  %v521_v42 = vadd.f32 %v1472_v4, %v454_v34 }
  0xea   : > { %v784_v39 = vadd.f32 %v764_v33, %v717_v36  ;;  %v587_v33 = vadd.f32 %v1462_v62, %v520_v26 }
  0xeb   : > { %v832_v40 = vpop.f32.mrf.mxu0 }
  0xec   : > { %v850_v19 = vadd.f32 %v830_v30, %v784_v39 }
  0xee   : > { %v858_v43 = vpack.c.bf16 %v850_v19, %v850_v19  ;;  %v322_v19 = vadd.f32 %v1489_v11, %v1456_v48 }
  0xef   : > { %v699_v49 = vpop.f32.mrf.mxu2 }
  0xf0   : > { %v766_v50 = vpop.f32.mrf.mxu3  ;;  %867 = vst.msk [vmem:[%s1517_s25] sm:$0xf] %vm866_vm2, %v858_v43  ;;  %v718_v52 = vadd.f32 %v699_v49, %v651_v41  ;;  %883 = vrot.lane.b32.xlu0 %v858_v43, %s1234_s26  ;;  %v635_v53 = vpop.f32.mrf.mxu1  ;;  %v916_v59 = vunpack.c.l.bf16 %v858_v43  ;;  %v389_v41 = vadd.f32 %v1474_v5, %v322_v19  ;;  %v323_v5 = vadd.f32 %v1489_v11, %v1452_v45 }
  0xf1   : > { %v652_v23 = vadd.f32 %v635_v53, %v586_v21  ;;  %v588_v53 = vadd.f32 %v1468_v2, %v521_v42 }
  0xf2   : > { %v785_v55 = vadd.f32 %v766_v50, %v718_v52  ;;  %v947_v29 = vmul.f32 %v916_v59, %v916_v59  ;;  %v924_v58 = vsel %vm271_vm1, %v916_v59, 0.0  ;;  %v455_v52 = vadd.f32 %v1478_v7, %v389_v41 }
  0xf3   : > { %v835_v56 = vpop.f32.mrf.mxu0  ;;  %v390_v2 = vadd.f32 %v1482_v9, %v323_v5  ;;  %v324_v9 = vadd.f32 %v1489_v11, %v1458_v20 }
  0xf4   : > { %v851_v14 = vadd.f32 %v832_v40, %v785_v55  ;;  %v955_v35 = vsel %vm271_vm1, %v947_v29, 0.0  ;;  %v522_v21 = vadd.f32 %v1480_v8, %v455_v52 }
  0xf5   : > { %v456_v29 = vadd.f32 %v1491_v12, %v390_v2 }
  0xf6   : > { %v859_v46 = vpack.c.bf16 %v851_v14, %v851_v14 }
  0xf7   : > { %v702_v27 = vpop.f32.mrf.mxu2 }
  0xf8   : > { %v769_v28 = vpop.f32.mrf.mxu3  ;;  %868 = vst.msk [vmem:[%s1517_s25 + $0x4] sm:$0xf] %vm866_vm2, %v859_v46  ;;  %v917_v61 = vunpack.c.l.bf16 %v859_v46  ;;  %v719_v30 = vadd.f32 %v702_v27, %v652_v23  ;;  %885 = vrot.lane.b32.xlu0 %v859_v46, %s1234_s26  ;;  %v637_v63 = vpop.f32.mrf.mxu1 }
  0xf9   : > { %v653_v39 = vadd.f32 %v637_v63, %v587_v33 }
  0xfa   : > { %v925_v32 = vsel %vm271_vm1, %v917_v61, 0.0  ;;  %v948_v15 = vmul.f32 %v917_v61, %v917_v61  ;;  %v786_v44 = vadd.f32 %v769_v28, %v719_v30  ;;  %v589_v61 = vadd.f32 %v1476_v6, %v522_v21 }
  0xfb   : > { %v837_v0 = vpop.f32.mrf.mxu0  ;;  %v926_v16 = vadd.f32 %v925_v32, %v924_v58  ;;  %v391_v6 = vadd.f32 %v1496_v17, %v324_v9 }
  0xfc   : > { %v956_v36 = vsel %vm271_vm1, %v948_v15, 0.0  ;;  %v852_v37 = vadd.f32 %v835_v56, %v786_v44  ;;  %v523_v44 = vadd.f32 %v1493_v13, %v456_v29 }
  0xfd   : > { %v957_v38 = vadd.f32 %v956_v36, %v955_v35 }
  0xfe   : > { %v860_v1 = vpack.c.bf16 %v852_v37, %v852_v37  ;;  %v457_v37 = vadd.f32 %v1500_v24, %v391_v6  ;;  %v590_v13 = vadd.f32 %v1484_v10, %v523_v44 }
  0xff   : > { %v704_v40 = vpop.f32.mrf.mxu2 }
 0x100   : > { %v771_v18 = vpop.f32.mrf.mxu3  ;;  %869 = vst.msk [vmem:[%s1517_s25 + $0x8] sm:$0xf] %vm866_vm2, %v860_v1  ;;  %v918_v62 = vunpack.c.l.bf16 %v860_v1  ;;  %v720_v43 = vadd.f32 %v704_v40, %v653_v39  ;;  %887 = vrot.lane.b32.xlu1 %v860_v1, %s1234_s26  ;;  %v640_v3 = vpop.f32.mrf.mxu1  ;;  %v524_v19 = vadd.f32 %v1502_v25, %v457_v37 }
 0x101   : > { %v654_v57 = vadd.f32 %v640_v3, %v588_v53 }
 0x102   : > { %v927_v47 = vsel %vm271_vm1, %v918_v62, 0.0  ;;  %v949_v49 = vmul.f32 %v918_v62, %v918_v62  ;;  %v787_v50 = vadd.f32 %v771_v18, %v720_v43 }
 0x103   : > { %v928_v51 = vadd.f32 %v927_v47, %v926_v16  ;;  %v840_v54 = vpop.f32.mrf.mxu0 }
 0x104   : > { %v958_v48 = vsel %vm271_vm1, %v949_v49, 0.0  ;;  %v853_v4 = vadd.f32 %v837_v0, %v787_v50  ;;  %v591_v50 = vadd.f32 %v1498_v22, %v524_v19 }
 0x105   : > { %v959_v55 = vadd.f32 %v958_v48, %v957_v38 }
 0x106   : > { %v861_v56 = vpack.c.bf16 %v853_v4, %v853_v4 }
 0x107   : > { %v707_v59 = vpop.f32.mrf.mxu2 }
 0x108   : > { %v774_v14 = vpop.f32.mrf.mxu3  ;;  %870 = vst.msk [vmem:[%s1517_s25 + $0xc] sm:$0xf] %vm866_vm2, %v861_v56  ;;  %v919_v46 = vunpack.c.l.bf16 %v861_v56  ;;  %v721_v7 = vadd.f32 %v707_v59, %v654_v57  ;;  %889 = vrot.lane.b32.xlu1 %v861_v56, %s1234_s26  ;;  %v642_v23 = vpop.f32.mrf.mxu1 }
 0x109   : > { %v655_v31 = vadd.f32 %v642_v23, %v589_v61 }
 0x10a   : > { %v929_v60 = vsel %vm271_vm1, %v919_v46, 0.0  ;;  %v950_v26 = vmul.f32 %v919_v46, %v919_v46  ;;  %v788_v27 = vadd.f32 %v774_v14, %v721_v7 }
 0x10b   : > { %v930_v28 = vadd.f32 %v929_v60, %v928_v51  ;;  %v842_v58 = vpop.f32.mrf.mxu0 }
 0x10c   : > { %v960_v45 = vsel %vm271_vm1, %v950_v26, 0.0  ;;  %v854_v8 = vadd.f32 %v840_v54, %v788_v27 }
 0x10d   : > { %v961_v30 = vadd.f32 %v960_v45, %v959_v55 }
 0x10e   : > { %v862_v63 = vpack.c.bf16 %v854_v8, %v854_v8 }
 0x10f   : > { %v709_v32 = vpop.f32.mrf.mxu2 }
 0x110   : > { %v776_v15 = vpop.f32.mrf.mxu3  ;;  %871 = vst.msk [vmem:[%s1517_s25 + $0x10] sm:$0xf] %vm866_vm2, %v862_v63  ;;  %v920_v0 = vunpack.c.l.bf16 %v862_v63  ;;  %v722_v12 = vadd.f32 %v709_v32, %v655_v31  ;;  %891 = vrot.lane.b32.xlu2 %v862_v63, %s1234_s26  ;;  %v645_v16 = vpop.f32.mrf.mxu1 }
 0x111   : > { %v656_v39 = vadd.f32 %v645_v16, %v590_v13 }
 0x112   : > { %v931_v33 = vsel %vm271_vm1, %v920_v0, 0.0  ;;  %v951_v34 = vmul.f32 %v920_v0, %v920_v0  ;;  %v789_v35 = vadd.f32 %v776_v15, %v722_v12 }
 0x113   : > { %v932_v36 = vadd.f32 %v931_v33, %v930_v28  ;;  %v845_v24 = vpop.f32.mrf.mxu0 }
 0x114   : > { %v962_v20 = vsel %vm271_vm1, %v951_v34, 0.0  ;;  %v855_v11 = vadd.f32 %v842_v58, %v789_v35 }
 0x115   : > { %v963_v38 = vadd.f32 %v962_v20, %v961_v30 }
 0x116   : > { %v863_v1 = vpack.c.bf16 %v855_v11, %v855_v11 }
 0x117   : > { %v712_v40 = vpop.f32.mrf.mxu2 }
 0x118   : > { %v779_v18 = vpop.f32.mrf.mxu3  ;;  %872 = vst.msk [vmem:[%s1517_s25 + $0x14] sm:$0xf] %vm866_vm2, %v863_v1  ;;  %v921_v17 = vunpack.c.l.bf16 %v863_v1  ;;  %v723_v42 = vadd.f32 %v712_v40, %v656_v39  ;;  %893 = vrot.lane.b32.xlu2 %v863_v1, %s1234_s26  ;;  %v647_v41 = vpop.f32.mrf.mxu1 }
 0x119   : > { %v657_v52 = vadd.f32 %v647_v41, %v591_v50 }
 0x11a   : > { %v933_v62 = vsel %vm271_vm1, %v921_v17, 0.0  ;;  %v952_v43 = vmul.f32 %v921_v17, %v921_v17  ;;  %v790_v3 = vadd.f32 %v779_v18, %v723_v42 }
 0x11b   : > { %v934_v10 = vadd.f32 %v933_v62, %v932_v36  ;;  %v847_v14 = vpop.f32.mrf.mxu0 }
 0x11c   : > { %v964_v47 = vsel %vm271_vm1, %v952_v43, 0.0  ;;  %v856_v49 = vadd.f32 %v845_v24, %v790_v3 }
 0x11d   : > { %v965_v25 = vadd.f32 %v964_v47, %v963_v38 }
 0x11e   : > { %v864_v51 = vpack.c.bf16 %v856_v49, %v856_v49 }
 0x11f   : > { %v714_v48 = vpop.f32.mrf.mxu2 }
 0x120   : > { %873 = vst.msk [vmem:[%s1517_s25 + $0x18] sm:$0xf] %vm866_vm2, %v864_v51  ;;  %v922_v4 = vunpack.c.l.bf16 %v864_v51  ;;  %v724_v53 = vadd.f32 %v714_v48, %v657_v52  ;;  %895 = vrot.lane.b32.xlu0 %v864_v51, %s1234_s26  ;;  %v781_v54 = vpop.f32.mrf.mxu3 }
 0x122   : > { %v935_v55 = vsel %vm271_vm1, %v922_v4, 0.0  ;;  %v953_v56 = vmul.f32 %v922_v4, %v922_v4  ;;  %v791_v57 = vadd.f32 %v781_v54, %v724_v53 }
 0x123   : > { %v936_v59 = vadd.f32 %v935_v55, %v934_v10 }
 0x124   : > { %v966_v22 = vsel %vm271_vm1, %v953_v56, 0.0  ;;  %v857_v5 = vadd.f32 %v847_v14, %v791_v57 }
 0x125   : > { %v967_v21 = vadd.f32 %v966_v22, %v965_v25 }
 0x126   : > { %v865_v46 = vpack.c.bf16 %v857_v5, %v857_v5 }
 0x128   : > { %874 = vst.msk [vmem:[%s1517_s25 + $0x1c] sm:$0xf] %vm866_vm2, %v865_v46  ;;  %v923_v7 = vunpack.c.l.bf16 %v865_v46  ;;  %897 = vrot.lane.b32.xlu1 %v865_v46, %s1234_s26 }
 0x12a   : > { %v937_v23 = vsel %vm271_vm1, %v923_v7, 0.0  ;;  %v954_v2 = vmul.f32 %v923_v7, %v923_v7 }
 0x12b   : > { %v938_v60 = vadd.f32 %v937_v23, %v936_v59 }
 0x12c   : > { %v968_v26 = vsel %vm271_vm1, %v954_v2, 0.0 }
 0x12d   : > { %v939_v27 = vrot.slane %v938_v60, 4  ;;  %v969_v28 = vadd.f32 %v968_v26, %v967_v21 }
 0x12f   : > { %v940_v29 = vadd.f32 %v939_v27, %v938_v60  ;;  %v970_v45 = vrot.slane %v969_v28, 4 }
 0x131   : > { %v941_v8 = vrot.slane %v940_v29, 2  ;;  %v971_v61 = vadd.f32 %v970_v45, %v969_v28 }
 0x133   : > { %v942_v30 = vadd.f32 %v941_v8, %v940_v29  ;;  %v972_v63 = vrot.slane %v971_v61, 2 }
 0x135   : > { %v943_v31 = vrot.slane %v942_v30, 1  ;;  %v973_v58 = vadd.f32 %v972_v63, %v971_v61 }
 0x137   : > { %v944_v32 = vadd.f32 %v943_v31, %v942_v30  ;;  %v974_v15 = vrot.slane %v973_v58, 1 }
 0x139   : > { %946 = vst.msk [vmem:[%s252_s30] sm:$0x1] %vm945_vm3, %v944_v32  ;;  %v975_v9 = vadd.f32 %v974_v15, %v973_v58 }
 0x13b   : > { %976 = vst.msk [vmem:[%s252_s30 + $0x1] sm:$0x1] %vm945_vm3, %v975_v9 }
 0x162   : > { %v884_v44 = vpop.permute.xlu0 %883 }
 0x163   : > { %908 = vst.msk [vmem:[%s248_s8] sm:$0xf] %vm907_vm4, %v884_v44 }
 0x16a   : > { %v892_v0 = vpop.permute.xlu2 %891  ;;  %v886_v12 = vpop.permute.xlu0 %885 }
 0x16b   : > { %912 = vst.msk [vmem:[%s248_s8 + $0x10] sm:$0xf] %vm907_vm4, %v892_v0 }
 0x16c   : > { %909 = vst.msk [vmem:[%s248_s8 + $0x4] sm:$0xf] %vm907_vm4, %v886_v12 }
 0x172   : > { %v888_v16 = vpop.permute.xlu1 %887  ;;  %v894_v6 = vpop.permute.xlu2 %893 }
 0x173   : > { %910 = vst.msk [vmem:[%s248_s8 + $0x8] sm:$0xf] %vm907_vm4, %v888_v16 }
 0x174   : > { %913 = vst.msk [vmem:[%s248_s8 + $0x14] sm:$0xf] %vm907_vm4, %v894_v6 }
 0x17a   : > { %v890_v33 = vpop.permute.xlu1 %889 }
 0x17b   : > { %911 = vst.msk [vmem:[%s248_s8 + $0xc] sm:$0xf] %vm907_vm4, %v890_v33 }
 0x192   : > { %v896_v34 = vpop.permute.xlu0 %895 }
 0x193   : > { %914 = vst.msk [vmem:[%s248_s8 + $0x18] sm:$0xf] %vm907_vm4, %v896_v34 }
 0x19a   : > { %v898_v35 = vpop.permute.xlu1 %897 }
 0x19b   : > { %915 = vst.msk [vmem:[%s248_s8 + $0x1c] sm:$0xf] %vm907_vm4, %v898_v35 }
 0x19c PF: > { %s16_s18 = sadd.s32 1, %s1232_s18  }
 0x19d   : > { %p13_p5 = scmp.ge.s32.totalorder %s16_s18, 4  }
 0x19f   :  { %15 = sbr.rel (!%p13_p5) target bundleno = 1 (0x1), region = 99 }

// kernel: res_down_forward.4
= control target key start
LH: loop header
LB: loop body
LE: loop exit
PB: predicated region body
PF: predicated region fallthrough
CT: control target
= control target key end

     0   :  { %s1423_s24 = smov 0   ;;  %s1807_s0 = inlined_call_operand.vmem [shape: bf16[2,64,4], index: 0, kind: input, shape index: {}]   ;;  %s1808_s1 = inlined_call_operand.vmem [shape: bf16[2,64,8], index: 1, kind: input, shape index: {}]   ;;  %s1809_s2 = inlined_call_operand.vmem [shape: f32[1,4], index: 2, kind: input, shape index: {}]   ;;  %s1810_s3 = inlined_call_operand.vmem [shape: f32[1,4], index: 3, kind: input, shape index: {}]   ;;  %s1811_s4 = inlined_call_operand.vmem [shape: bf16[9,4,8], index: 4, kind: input, shape index: {}]   ;;  %s1812_s5 = inlined_call_operand.vmem [shape: f32[1,8], index: 5, kind: input, shape index: {}]   ;;  %s1813_s6 = inlined_call_operand.vmem [shape: bf16[2,64,8], index: 6, kind: output, shape index: {0}]   ;;  %s1814_s7 = inlined_call_operand.vmem [shape: f32[2,2,8], index: 7, kind: output, shape index: {1}]  }
   0x1 LB: > { %s1236_s25 = sadd.s32 4294967295, %s1380_s24   ;;  %p1240_p0 = scmp.ge.s32.totalorder %s1380_s24, 1  ;;  %s1380_s24 = sphi %s1423_s24, %s18_s24  }
   0x2   : > { %p250_p1 = scmp.lt.s32.totalorder %s1380_s24, 3 }
   0x4   : > { %p251_p2 = pnand %p1240_p0, %p250_p1 }
   0x5   : > { %p291_p3 = scmp.lt.s32.totalorder (!%p251_p2), %s1236_s25, 1 }
   0x6   : > { %254 = sbr.rel (%p251_p2) target bundleno = 346 (0x15a), region = 44 }
   0xb   : > { %v476_v0 = vld [vmem:[%s1811_s4] sm:$0x3]  ;;  %vm489_vm0 = vcmask 1041408   ;;  %vm311_vm1 = vcmask 31744   ;;  %vm318_vm2 = vcmask 24576   ;;  %s1816_s25 = smov (!%p291_p3, %s1236_s25), 1 }
   0xc   : > { %v491_v1 = vsel %vm489_vm0, %v476_v0, 0  ;;  %v1382_v2 = vmov 0.0   ;;  %s1442_s28 = sshll.u32 %s1816_s25, 5  ;;  %v1453_v3 = vld [vmem:[%s1809_s2] ss:$0 sm:$0xff]  ;;  %vm313_vm3 = vcmask 25600  }
   0xd   : > { %1343 = vmatpush.bf16.msra.mxu1 %v491_v1  ;;  %1344 = vmatpush.bf16.msra.mxu2 %v491_v1  ;;  %321 = vst.msk [vmem:[#allocation2 + $0x20] sm:$0x1] %vm318_vm2, %v1382_v2  ;;  %s295_s8 = scalar_lea.vmem %s1807_s0, %s1442_s28  ;;  %v1462_v9 = vld [vmem:[%s1810_s3] ss:$0 sm:$0xff]  ;;  %v1265_v22 = vld [vmem:[%s1811_s4 + $0x4] sm:$0x3]  ;;  %s1693_s11 = scalar_lea.vmem %s1808_s1, %s1442_s28 }
   0xe   : > { %1345 = vmatpush.bf16.msra.mxu3 %v491_v1  ;;  %500 = vmatpush.bf16.msra.mxu0 %v491_v1  ;;  %322 = vst.msk [vmem:[#allocation2 + $0x30] sm:$0x1] %vm318_vm2, %v1382_v2  ;;  %v1306_v4 = vld [vmem:[%s295_s8] sm:$0xff]   ;;  %v1337_v5 = vld [vmem:[%s295_s8 + $0x8] sm:$0xff]   ;;  %v1338_v6 = vld [vmem:[%s295_s8 + $0x10] sm:$0xff]   ;;  %v623_v28 = vsel %vm489_vm0, %v1265_v22, 0  ;;  %s1734_s16 = scalar_lea.vmem %s1813_s6, %s1442_s28 }
   0xf   : > { %312 = vst.msk [vmem:[#allocation2] sm:$0xff] %vm311_vm1, %v1382_v2  ;;  %v1308_v7 = vunpack.c.h.bf16 %v1306_v4  ;;  %v1311_v8 = vunpack.c.l.bf16 %v1337_v5  ;;  %v1312_v10 = vunpack.c.h.bf16 %v1337_v5  ;;  %v1315_v11 = vunpack.c.l.bf16 %v1338_v6  ;;  %v1466_v12 = vld [vmem:[%s295_s8 + $0x18] sm:$0xff]   ;;  %v1270_v36 = vld [vmem:[%s1811_s4 + $0x6] sm:$0x3]  ;;  %v1260_v37 = vld [vmem:[%s1811_s4 + $0x2] sm:$0x3] }
  0x10   : > { %316 = vst.msk [vmem:[#allocation2 + $0x90] sm:$0xff] %vm311_vm1, %v1382_v2  ;;  %v1316_v13 = vunpack.c.h.bf16 %v1338_v6  ;;  %v1319_v14 = vunpack.c.l.bf16 %v1466_v12  ;;  %v1307_v15 = vunpack.c.l.bf16 %v1306_v4  ;;  %v1275_v45 = vld [vmem:[%s1811_s4 + $0x8] sm:$0x3]  ;;  %v689_v47 = vsel %vm489_vm0, %v1270_v36, 0  ;;  %s1247_s28 = sshll.u32 %s1816_s25, 1 }
  0x11   : > { %320 = vst.msk [vmem:[#allocation2 + $0x10] sm:$0x1] %vm318_vm2, %v1382_v2  ;;  %v360_v16 = vmul.f32 %v1453_v3, %v1308_v7  ;;  %v361_v17 = vmul.f32 %v1453_v3, %v1311_v8  ;;  %v362_v18 = vmul.f32 %v1453_v3, %v1312_v10  ;;  %v363_v19 = vmul.f32 %v1453_v3, %v1315_v11  ;;  %v1280_v11 = vld [vmem:[%s1811_s4 + $0xa] sm:$0x3]  ;;  %s309_s19 = scalar_lea.vmem %s1814_s7, %s1247_s28 }
  0x12   : > { %323 = vst.msk [vmem:[#allocation2 + $0x40] sm:$0x1] %vm318_vm2, %v1382_v2  ;;  %v364_v20 = vmul.f32 %v1453_v3, %v1316_v13  ;;  %v365_v21 = vmul.f32 %v1453_v3, %v1319_v14  ;;  %v359_v23 = vmul.f32 %v1453_v3, %v1307_v15  ;;  %632 = vmatpush.bf16.msrb.mxu2 %v623_v28  ;;  %v557_v48 = vsel %vm489_vm0, %v1260_v37, 0  ;;  %v1285_v15 = vld [vmem:[%s1811_s4 + $0xc] sm:$0x3] }
  0x13   : > { %324 = vst.msk [vmem:[#allocation2 + $0x50] sm:$0x1] %vm318_vm2, %v1382_v2  ;;  %v1486_v24 = vadd.f32 %v1462_v9, %v360_v16  ;;  %v1489_v25 = vadd.f32 %v1462_v9, %v361_v17  ;;  %v1494_v26 = vadd.f32 %v1462_v9, %v362_v18  ;;  %v1497_v27 = vadd.f32 %v1462_v9, %v363_v19 }
  0x14   : > { %325 = vst.msk [vmem:[#allocation2 + $0x60] sm:$0x1] %vm318_vm2, %v1382_v2  ;;  %v1507_v31 = vadd.f32 %v1462_v9, %v364_v20  ;;  %v1514_v34 = vadd.f32 %v1462_v9, %v365_v21  ;;  %v1517_v35 = vadd.f32 %v1462_v9, %v359_v23  ;;  %698 = vmatpush.bf16.msrb.mxu3 %v689_v47  ;;  %v755_v51 = vsel %vm489_vm0, %v1275_v45, 0  ;;  %v1290_v20 = vld [vmem:[%s1811_s4 + $0xe] sm:$0x3] }
  0x15   : > { %326 = vst.msk [vmem:[#allocation2 + $0x70] sm:$0x1] %vm318_vm2, %v1382_v2  ;;  %v388_v29 = vmin.f32 %v1486_v24, 0.0  ;;  %v389_v30 = vmin.f32 %v1489_v25, 0.0  ;;  %v390_v32 = vmin.f32 %v1494_v26, 0.0  ;;  %v391_v33 = vmin.f32 %v1497_v27, 0.0  ;;  %566 = vmatpush.bf16.msrb.mxu1 %v557_v48  ;;  %764 = vmatpush.bf16.msrb.mxu0 %v755_v51 }
  0x16   : > { %327 = vst.msk [vmem:[#allocation2 + $0x80] sm:$0x1] %vm318_vm2, %v1382_v2  ;;  %v392_v42 = vmin.f32 %v1507_v31, 0.0  ;;  %v393_v43 = vmin.f32 %v1514_v34, 0.0  ;;  %v387_v44 = vmin.f32 %v1517_v35, 0.0  ;;  %vm380_vm4 = vcmp.gt.f32.partialorder %v1486_v24, 0.0 }
  0x17   : > { %330 = vst.msk [vmem:[#allocation2 + $0x19] sm:$0x1] %vm318_vm2, %v1382_v2  ;;  %v397_v38 = vmul.f32 1.442695, %v388_v29  ;;  %v399_v39 = vmul.f32 1.442695, %v389_v30 }
  0x18   : > { %331 = vst.msk [vmem:[#allocation2 + $0x29] sm:$0x1] %vm318_vm2, %v1382_v2  ;;  %v401_v40 = vmul.f32 1.442695, %v390_v32  ;;  %v403_v41 = vmul.f32 1.442695, %v391_v33  ;;  %v1320_v32 = vunpack.c.h.bf16 %v1466_v12 }
  0x19   : > { %332 = vst.msk [vmem:[#allocation2 + $0x39] sm:$0x1] %vm318_vm2, %v1382_v2  ;;  %1358 = vpow2.f32 %v397_v38  ;;  %v405_v46 = vmul.f32 1.442695, %v392_v42  ;;  %v407_v49 = vmul.f32 1.442695, %v393_v43 }
  0x1a   : > { %333 = vst.msk [vmem:[#allocation2 + $0x49] sm:$0x1] %vm318_vm2, %v1382_v2  ;;  %1360 = vpow2.f32 %v399_v39  ;;  %v395_v50 = vmul.f32 1.442695, %v387_v44  ;;  %vm381_vm5 = vcmp.gt.f32.partialorder %v1489_v25, 0.0  ;;  %vm382_vm6 = vcmp.gt.f32.partialorder %v1494_v26, 0.0 }
  0x1b   : > { %334 = vst.msk [vmem:[#allocation2 + $0x59] sm:$0x1] %vm318_vm2, %v1382_v2  ;;  %1362 = vpow2.f32 %v401_v40  ;;  %vm383_vm7 = vcmp.gt.f32.partialorder %v1497_v27, 0.0  ;;  %vm384_vm8 = vcmp.gt.f32.partialorder %v1507_v31, 0.0  ;;  %vm385_vm9 = vcmp.gt.f32.partialorder %v1514_v34, 0.0 }
  0x1c   : > { %335 = vst.msk [vmem:[#allocation2 + $0x69] sm:$0x1] %vm318_vm2, %v1382_v2  ;;  %1364 = vpow2.f32 %v403_v41  ;;  %vm379_vm10 = vcmp.gt.f32.partialorder %v1517_v35, 0.0  ;;  %v821_v18 = vsel %vm489_vm0, %v1280_v11, 0  ;;  %v954_v29 = vsel %vm489_vm0, %v1290_v20, 0 }
  0x1d   : > { %336 = vst.msk [vmem:[#allocation2 + $0x79] sm:$0x1] %vm318_vm2, %v1382_v2  ;;  %1366 = vpow2.f32 %v405_v46  ;;  %v366_v33 = vmul.f32 %v1453_v3, %v1320_v32  ;;  %vm1067_vm12 = vcmask 60416   ;;  %vm1084_vm13 = vcmask 64512  }
  0x1e   : > { %337 = vst.msk [vmem:[#allocation2 + $0x89] sm:$0x1] %vm318_vm2, %v1382_v2  ;;  %1368 = vpow2.f32 %v407_v49  ;;  %vm1106_vm14 = vcmask 57344  }
  0x1f   : > { %319 = vst.msk [vmem:[#allocation2] sm:$0x1] %vm318_vm2, %v1382_v2  ;;  %v1359_v52 = vpop.eup %1358  ;;  %1370 = vpow2.f32 %v395_v50  ;;  %v378_v36 = vadd.f32 %v1462_v9, %v366_v33 }
  0x20   : > { %328 = vst.msk [vmem:[#allocation2 + $0x90] sm:$0x1] %vm318_vm2, %v1382_v2  ;;  %v1361_v53 = vpop.eup %1360  ;;  %v1249_v54 = vadd.f32 -1.0, %v1359_v52 }
  0x21   : > { %314 = vst.msk [vmem:[#allocation2 + $0x8] sm:$0x3] %vm313_vm3, %v1382_v2  ;;  %v1363_v55 = vpop.eup %1362  ;;  %v1250_v56 = vadd.f32 -1.0, %v1361_v53  ;;  %v394_v40 = vmin.f32 %v378_v36, 0.0  ;;  %vm386_vm11 = vcmp.gt.f32.partialorder %v378_v36, 0.0 }
  0x22   : > { %317 = vst.msk [vmem:[#allocation2 + $0x98] sm:$0x3] %vm313_vm3, %v1382_v2  ;;  %v1365_v57 = vpop.eup %1364  ;;  %v420_v58 = vsel %vm380_vm4, %v1486_v24, %v1249_v54  ;;  %v1251_v59 = vadd.f32 -1.0, %v1363_v55  ;;  %v888_v24 = vsel %vm489_vm0, %v1285_v15, 0 }
  0x23   : > { %329 = vst.msk [vmem:[#allocation2 + $0x9] sm:$0x1] %vm318_vm2, %v1382_v2  ;;  %v1367_v60 = vpop.eup %1366  ;;  %v421_v61 = vsel %vm381_vm5, %v1489_v25, %v1250_v56  ;;  %v1252_v62 = vadd.f32 -1.0, %v1365_v57  ;;  %v1295_v25 = vld [vmem:[%s1811_s4 + $0x10] sm:$0x3] }
  0x24   : > { %338 = vst.msk [vmem:[#allocation2 + $0x99] sm:$0x1] %vm318_vm2, %v1382_v2  ;;  %v1369_v63 = vpop.eup %1368  ;;  %v422_v0 = vsel %vm382_vm6, %v1494_v26, %v1251_v59  ;;  %v1253_v1 = vadd.f32 -1.0, %v1367_v60  ;;  %v409_v43 = vmul.f32 1.442695, %v394_v40 }
  0x25   : > { %429 = vst.msk [vmem:[#allocation2 + $0x21] sm:$0xff] %vm311_vm1, %v420_v58  ;;  %v1371_v2 = vpop.eup %1370  ;;  %v423_v4 = vsel %vm383_vm7, %v1497_v27, %v1252_v62  ;;  %v1254_v5 = vadd.f32 -1.0, %v1369_v63 }
  0x26   : > { %430 = vst.msk [vmem:[#allocation2 + $0x31] sm:$0xff] %vm311_vm1, %v421_v61  ;;  %v424_v6 = vsel %vm384_vm8, %v1507_v31, %v1253_v1  ;;  %v1248_v7 = vadd.f32 -1.0, %v1371_v2  ;;  %v464_v23 = vld [vmem:[#allocation2] sm:$0xff]  ;;  %v1020_v31 = vsel %vm489_vm0, %v1295_v25, 0  ;;  %1372 = vpow2.f32 %v409_v43 }
  0x27   : > { %431 = vst.msk [vmem:[#allocation2 + $0x41] sm:$0xff] %vm311_vm1, %v422_v0  ;;  %v425_v8 = vsel %vm385_vm9, %v1514_v34, %v1254_v5 }
  0x28   : > { %432 = vst.msk [vmem:[#allocation2 + $0x51] sm:$0xff] %vm311_vm1, %v423_v4  ;;  %v419_v10 = vsel %vm379_vm10, %v1517_v35, %v1248_v7  ;;  %v530_v34 = vld [vmem:[#allocation2 + $0x1] sm:$0xff] }
  0x29   : > { %433 = vst.msk [vmem:[#allocation2 + $0x61] sm:$0xff] %vm311_vm1, %v424_v6 }
  0x2a   : > { %434 = vst.msk [vmem:[#allocation2 + $0x71] sm:$0xff] %vm311_vm1, %v425_v8  ;;  %v596_v37 = vld [vmem:[#allocation2 + $0x2] sm:$0xff] }
  0x2b   : > { %428 = vst.msk [vmem:[#allocation2 + $0x11] sm:$0xff] %vm311_vm1, %v419_v10 }
  0x2c   : > { %v466_v13 = vld [vmem:[#allocation2 + $0x20] sm:$0xff]  ;;  %v1373_v3 = vpop.eup %1372 }
  0x2d   : > { %v467_v14 = vld [vmem:[#allocation2 + $0x30] sm:$0xff]  ;;  %v729_v42 = vld [vmem:[#allocation2 + $0x21] sm:$0xff]  ;;  %v1255_v9 = vadd.f32 -1.0, %v1373_v3 }
  0x2e   : > { %v1581_v16 = vpack.c.bf16 %v467_v14, %v466_v13  ;;  %v468_v17 = vld [vmem:[#allocation2 + $0x40] sm:$0xff]  ;;  %v533_v12 = vld [vmem:[#allocation2 + $0x31] sm:$0xff] }
  0x2f   : > { %v1584_v19 = vld [vmem:[#allocation2 + $0x50] sm:$0xff]  ;;  %v426_v46 = vsel %vm386_vm11, %v378_v36, %v1255_v9  ;;  %v598_v47 = vld [vmem:[#allocation2 + $0x22] sm:$0xff]  ;;  %v539_v49 = vpack.c.bf16 %v533_v12, %v729_v42  ;;  %v671_v52 = vpack.c.bf16 %v468_v17, %v467_v14 }
  0x30   : > { %1257 = vmatmul.msk.bf16.vlgmr.msra.gmra.mxu1 %vm311_vm1, %v1581_v16  ;;  %v1592_v21 = vpack.c.bf16 %v1584_v19, %v468_v17  ;;  %v1594_v22 = vld [vmem:[#allocation2 + $0x60] sm:$0xff]  ;;  %435 = vst.msk [vmem:[#allocation2 + $0x81] sm:$0xff] %vm311_vm1, %v426_v46  ;;  %v599_v48 = vld [vmem:[#allocation2 + $0x32] sm:$0xff] }
  0x31   : > { %v1600_v26 = vld [vmem:[#allocation2 + $0x70] sm:$0xff]  ;;  %830 = vmatpush.bf16.msra.mxu1 %v821_v18  ;;  %v605_v50 = vpack.c.bf16 %v599_v48, %v598_v47  ;;  %v731_v51 = vld [vmem:[#allocation2 + $0x41] sm:$0xff]  ;;  %v672_v60 = vpack.c.bf16 %v1594_v22, %v1584_v19 }
  0x32   : > { %1258 = vmatmul.msk.bf16.vlgmr.msra.gmra.mxu2 %vm311_vm1, %v1592_v21  ;;  %v1606_v27 = vpack.c.bf16 %v1600_v26, %v1594_v22  ;;  %v465_v28 = vld [vmem:[#allocation2 + $0x10] sm:$0xff]  ;;  %v737_v53 = vpack.c.bf16 %v731_v51, %v533_v12  ;;  %v600_v55 = vld [vmem:[#allocation2 + $0x42] sm:$0xff] }
  0x33   : > { %v472_v30 = vpack.c.bf16 %v465_v28, %v464_v23  ;;  %897 = vmatpush.bf16.msra.mxu2 %v888_v24  ;;  %v531_v35 = vld [vmem:[#allocation2 + $0x11] sm:$0xff]  ;;  %v670_v44 = vpack.c.bf16 %v466_v13, %v465_v28  ;;  %v733_v59 = vld [vmem:[#allocation2 + $0x61] sm:$0xff]  ;;  %v803_v10 = vpack.c.bf16 %v600_v55, %v599_v48 }
  0x34   : > { %1259 = vmatmul.msk.bf16.vlgmr.msra.gmra.mxu3 %vm311_vm1, %v1606_v27  ;;  %v597_v38 = vld [vmem:[#allocation2 + $0x12] sm:$0xff]  ;;  %v538_v39 = vpack.c.bf16 %v531_v35, %v530_v34  ;;  %v736_v45 = vpack.c.bf16 %v729_v42, %v531_v35  ;;  %v602_v63 = vld [vmem:[#allocation2 + $0x62] sm:$0xff] }
  0x35   : > { %1256 = vmatmul.msk.bf16.vlgmr.msra.gmra.mxu0 %vm311_vm1, %v472_v30  ;;  %963 = vmatpush.bf16.msra.mxu3 %v954_v29  ;;  %v604_v41 = vpack.c.bf16 %v597_v38, %v596_v37  ;;  %v535_v54 = vld [vmem:[#allocation2 + $0x51] sm:$0xff]  ;;  %v802_v8 = vpack.c.bf16 %v598_v47, %v597_v38  ;;  %v1322_v48 = vld [vmem:[%s1693_s11] sm:$0xff]  }
  0x36   : > { %1029 = vmatpush.bf16.msra.mxu0 %v1020_v31  ;;  %v601_v56 = vld [vmem:[#allocation2 + $0x52] sm:$0xff]  ;;  %v540_v57 = vpack.c.bf16 %v535_v54, %v731_v51  ;;  %v738_v61 = vpack.c.bf16 %v733_v59, %v535_v54  ;;  %v1323_v51 = vunpack.c.l.bf16 %v1322_v48 }
  0x37   : > { %v606_v58 = vpack.c.bf16 %v601_v56, %v600_v55  ;;  %v537_v62 = vld [vmem:[#allocation2 + $0x71] sm:$0xff]  ;;  %v669_v2 = vld [vmem:[#allocation2 + $0x80] sm:$0xff]  ;;  %v804_v11 = vpack.c.bf16 %v602_v63, %v601_v56 }
  0x38   : > { %v603_v0 = vld [vmem:[#allocation2 + $0x72] sm:$0xff]  ;;  %v541_v1 = vpack.c.bf16 %v537_v62, %v733_v59  ;;  %v735_v5 = vld [vmem:[#allocation2 + $0x81] sm:$0xff]  ;;  %v673_v6 = vpack.c.bf16 %v669_v2, %v1600_v26  ;;  %v1324_v59 = vunpack.c.h.bf16 %v1322_v48 }
  0x39   : > { %v607_v4 = vpack.c.bf16 %v603_v0, %v602_v63  ;;  %v739_v7 = vpack.c.bf16 %v735_v5, %v537_v62  ;;  %v801_v13 = vld [vmem:[#allocation2 + $0x82] sm:$0xff]  ;;  %v868_v14 = vld [vmem:[#allocation2 + $0x90] sm:$0xff] }
  0x3a   : > { %v805_v15 = vpack.c.bf16 %v801_v13, %v603_v0  ;;  %v934_v17 = vld [vmem:[#allocation2 + $0x91] sm:$0xff]  ;;  %v872_v18 = vpack.c.bf16 %v868_v14, %v669_v2 }
  0x3b   : > { %v1000_v19 = vld [vmem:[#allocation2 + $0x92] sm:$0xff]  ;;  %v938_v20 = vpack.c.bf16 %v934_v17, %v735_v5 }
  0x3c   : > { %v1341_v48 = vld [vmem:[%s1693_s11 + $0x10] sm:$0xff]  }
  0x40   : > { %1261 = vmatmul.msk.bf16.vlgmr.msrb.gmra.mxu1 %vm311_vm1, %v538_v39 }
  0x42   : > { %1266 = vmatmul.msk.bf16.vlgmr.msrb.gmra.mxu2 %vm311_vm1, %v604_v41 }
  0x44   : > { %1271 = vmatmul.msk.bf16.vlgmr.msrb.gmra.mxu3 %vm311_vm1, %v670_v44 }
  0x45   : > { %1276 = vmatmul.msk.bf16.vlgmr.msrb.gmra.mxu0 %vm311_vm1, %v736_v45 }
  0x50   : > { %1262 = vmatmul.msk.bf16.gmra.mxu1 %vm311_vm1, %v539_v49 }
  0x52   : > { %1267 = vmatmul.msk.bf16.gmra.mxu2 %vm311_vm1, %v605_v50 }
  0x54   : > { %1272 = vmatmul.msk.bf16.gmra.mxu3 %vm311_vm1, %v671_v52 }
  0x55   : > { %1277 = vmatmul.msk.bf16.gmra.mxu0 %vm311_vm1, %v737_v53  ;;  %v1707_v53 = vld [vmem:[%s1812_s5] ss:$0 sm:$0xff] }
  0x56   : > { %v456_v54 = vadd.f32 %v1707_v53, %v1323_v51  ;;  %v457_v62 = vadd.f32 %v1707_v53, %v1324_v59 }
  0x60   : > { %1263 = vmatmul.msk.bf16.gmra.mxu1 %vm311_vm1, %v540_v57 }
  0x62   : > { %1268 = vmatmul.msk.bf16.gmra.mxu2 %vm311_vm1, %v606_v58 }
  0x64   : > { %1273 = vmatmul.msk.bf16.gmra.mxu3 %vm311_vm1, %v672_v60 }
  0x65   : > { %1278 = vmatmul.msk.bf16.gmra.mxu0 %vm311_vm1, %v738_v61 }
  0x70   : > { %1264 = vmatmul.msk.bf16.gmra.mxu1 %vm311_vm1, %v541_v1 }
  0x72   : > { %1269 = vmatmul.msk.bf16.gmra.mxu2 %vm311_vm1, %v607_v4 }
  0x74   : > { %1274 = vmatmul.msk.bf16.gmra.mxu3 %vm311_vm1, %v673_v6 }
  0x75   : > { %1279 = vmatmul.msk.bf16.gmra.mxu0 %vm311_vm1, %v739_v7 }
  0x80   : > { %1281 = vmatmul.msk.bf16.vlgmr.msra.gmra.mxu1 %vm311_vm1, %v802_v8 }
  0x82   : > { %1286 = vmatmul.msk.bf16.vlgmr.msra.gmra.mxu2 %vm311_vm1, %v1581_v16 }
  0x84   : > { %1291 = vmatmul.msk.bf16.vlgmr.msra.gmra.mxu3 %vm311_vm1, %v539_v49 }
  0x85   : > { %1296 = vmatmul.msk.bf16.vlgmr.msra.gmra.mxu0 %vm311_vm1, %v605_v50 }
  0x90   : > { %1282 = vmatmul.msk.bf16.gmra.mxu1 %vm311_vm1, %v803_v10 }
  0x92   : > { %1287 = vmatmul.msk.bf16.gmra.mxu2 %vm311_vm1, %v1592_v21  ;;  %v1004_v21 = vpack.c.bf16 %v1000_v19, %v801_v13 }
  0x94   : > { %1292 = vmatmul.msk.bf16.gmra.mxu3 %vm311_vm1, %v540_v57 }
  0x95   : > { %1297 = vmatmul.msk.bf16.gmra.mxu0 %vm311_vm1, %v606_v58 }
  0xa0   : > { %1283 = vmatmul.msk.bf16.gmra.mxu1 %vm311_vm1, %v804_v11 }
  0xa2   : > { %1288 = vmatmul.msk.bf16.gmra.mxu2 %vm311_vm1, %v1606_v27 }
  0xa4   : > { %1293 = vmatmul.msk.bf16.gmra.mxu3 %vm311_vm1, %v541_v1  ;;  %v1340_v1 = vld [vmem:[%s1693_s11 + $0x8] sm:$0xff]  }
  0xa5   : > { %1298 = vmatmul.msk.bf16.gmra.mxu0 %vm311_vm1, %v607_v4  ;;  %v1327_v5 = vunpack.c.l.bf16 %v1340_v1 }
  0xa7   : > { %v458_v11 = vadd.f32 %v1707_v53, %v1327_v5 }
  0xad   : > { %v1651_v16 = vpop.f32.mrf.mxu1 }
  0xb0   : > { %1284 = vmatmul.msk.bf16.gmra.mxu1 %vm311_vm1, %v805_v15 }
  0xb2   : > { %v502_v22 = vpop.f32.mrf.mxu0  ;;  %1289 = vmatmul.msk.bf16.gmra.mxu2 %vm311_vm1, %v872_v18  ;;  %v1328_v18 = vunpack.c.h.bf16 %v1340_v1 }
  0xb3   : > { %v522_v58 = vadd.f32 %v502_v22, %v456_v54 }
  0xb4   : > { %1294 = vmatmul.msk.bf16.gmra.mxu3 %vm311_vm1, %v938_v20 }
  0xb5   : > { %1299 = vmatmul.msk.bf16.gmra.mxu0 %vm311_vm1, %v1004_v21  ;;  %v1657_v23 = vpop.f32.mrf.mxu2  ;;  %v1659_v24 = vpop.f32.mrf.mxu1  ;;  %v524_v21 = vadd.f32 %v1651_v16, %v458_v11 }
  0xb7   : > { %v1661_v25 = vpop.f32.mrf.mxu3 }
  0xba   : > { %v504_v26 = vpop.f32.mrf.mxu0 }
  0xbb   : > { %v523_v6 = vadd.f32 %v504_v26, %v457_v62 }
  0xbd   : > { %v1663_v27 = vpop.f32.mrf.mxu2  ;;  %v568_v28 = vpop.f32.mrf.mxu1 }
  0xbe   : > { %v588_v61 = vadd.f32 %v568_v28, %v522_v58  ;;  %v1331_v58 = vunpack.c.l.bf16 %v1341_v48 }
  0xbf   : > { %v1665_v29 = vpop.f32.mrf.mxu3 }
  0xc2   : > { %v766_v30 = vpop.f32.mrf.mxu0 }
  0xc5   : > { %v634_v31 = vpop.f32.mrf.mxu2  ;;  %v570_v32 = vpop.f32.mrf.mxu1 }
  0xc6   : > { %v654_v63 = vadd.f32 %v634_v31, %v588_v61  ;;  %v589_v10 = vadd.f32 %v570_v32, %v523_v6  ;;  %v459_v32 = vadd.f32 %v1707_v53, %v1328_v18 }
  0xc7   : > { %v700_v33 = vpop.f32.mrf.mxu3 }
  0xc8   : > { %v720_v7 = vadd.f32 %v700_v33, %v654_v63 }
  0xca   : > { %v768_v34 = vpop.f32.mrf.mxu0  ;;  %v786_v14 = vadd.f32 %v766_v30, %v720_v7 }
  0xcd   : > { %v636_v35 = vpop.f32.mrf.mxu2  ;;  %v573_v36 = vpop.f32.mrf.mxu1 }
  0xce   : > { %v655_v13 = vadd.f32 %v636_v35, %v589_v10  ;;  %v590_v31 = vadd.f32 %v573_v36, %v524_v21  ;;  %v525_v36 = vadd.f32 %v1659_v24, %v459_v32 }
  0xcf   : > { %v702_v37 = vpop.f32.mrf.mxu3 }
  0xd0   : > { %v721_v22 = vadd.f32 %v702_v37, %v655_v13 }
  0xd2   : > { %v1667_v38 = vpop.f32.mrf.mxu0  ;;  %v787_v35 = vadd.f32 %v768_v34, %v721_v22 }
  0xd5   : > { %v639_v39 = vpop.f32.mrf.mxu2  ;;  %v1669_v40 = vpop.f32.mrf.mxu1 }
  0xd6   : > { %v656_v51 = vadd.f32 %v639_v39, %v590_v31  ;;  %v591_v39 = vadd.f32 %v1669_v40, %v525_v36 }
  0xd7   : > { %v1671_v41 = vpop.f32.mrf.mxu3 }
  0xd8   : > { %v722_v62 = vadd.f32 %v1671_v41, %v656_v51 }
  0xda   : > { %v1673_v42 = vpop.f32.mrf.mxu0  ;;  %v788_v24 = vadd.f32 %v1667_v38, %v722_v62 }
  0xdd   : > { %v1675_v43 = vpop.f32.mrf.mxu2  ;;  %v1677_v44 = vpop.f32.mrf.mxu1 }
  0xde   : > { %v657_v5 = vadd.f32 %v1675_v43, %v591_v39 }
  0xdf   : > { %v1679_v45 = vpop.f32.mrf.mxu3 }
  0xe2   : > { %v1681_v3 = vpop.f32.mrf.mxu0 }
  0xe5   : > { %v1683_v9 = vpop.f32.mrf.mxu2  ;;  %v1685_v12 = vpop.f32.mrf.mxu1 }
  0xe7   : > { %v1687_v46 = vpop.f32.mrf.mxu3 }
  0xea   : > { %v1695_v47 = vpop.f32.mrf.mxu0 }
  0xed   : > { %v1698_v49 = vpop.f32.mrf.mxu2  ;;  %v1700_v50 = vpop.f32.mrf.mxu1 }
  0xef   : > { %v1702_v52 = vpop.f32.mrf.mxu3 }
  0xf2   : > { %v1710_v55 = vpop.f32.mrf.mxu0 }
  0xf5   : > { %v1712_v56 = vpop.f32.mrf.mxu2  ;;  %v1714_v57 = vpop.f32.mrf.mxu1 }
  0xf7   : > { %v1716_v60 = vpop.f32.mrf.mxu3 }
  0xfa   : > { %v1719_v0 = vpop.f32.mrf.mxu0 }
  0xfd   : > { %v1722_v2 = vpop.f32.mrf.mxu2  ;;  %v832_v4 = vpop.f32.mrf.mxu1 }
  0xfe   : > { %v852_v17 = vadd.f32 %v832_v4, %v786_v14  ;;  %v460_v4 = vadd.f32 %v1707_v53, %v1331_v58  ;;  %v1332_v14 = vunpack.c.h.bf16 %v1341_v48 }
  0xff   : > { %v1724_v8 = vpop.f32.mrf.mxu3 }
 0x100   : > { %v526_v41 = vadd.f32 %v1657_v23, %v460_v4 }
 0x102   : > { %v1031_v15 = vpop.f32.mrf.mxu0 }
 0x105   : > { %v899_v19 = vpop.f32.mrf.mxu2  ;;  %v834_v20 = vpop.f32.mrf.mxu1 }
 0x106   : > { %v919_v28 = vadd.f32 %v899_v19, %v852_v17  ;;  %v853_v37 = vadd.f32 %v834_v20, %v787_v35  ;;  %v592_v20 = vadd.f32 %v1677_v44, %v526_v41 }
 0x107   : > { %v965_v26 = vpop.f32.mrf.mxu3 }
 0x108   : > { %v985_v33 = vadd.f32 %v965_v26, %v919_v28  ;;  %v658_v32 = vadd.f32 %v1683_v9, %v592_v20 }
 0x10a   : > { %v1051_v54 = vadd.f32 %v1031_v15, %v985_v33  ;;  %v1033_v30 = vpop.f32.mrf.mxu0  ;;  %v723_v15 = vadd.f32 %v1679_v45, %v657_v5  ;;  %v461_v45 = vadd.f32 %v1707_v53, %v1332_v14  ;;  %v1342_v33 = vld [vmem:[%s1693_s11 + $0x18] sm:$0xff]  }
 0x10c   : > { %v1059_v16 = vpack.c.bf16 %v1051_v54, %v1051_v54  ;;  %v789_v31 = vadd.f32 %v1673_v42, %v723_v15 }
 0x10d   : > { %v901_v59 = vpop.f32.mrf.mxu2  ;;  %v837_v61 = vpop.f32.mrf.mxu1 }
 0x10e   : > { %1068 = vst.msk [vmem:[%s1734_s16] sm:$0xf] %vm1067_vm12, %v1059_v16  ;;  %v920_v34 = vadd.f32 %v901_v59, %v853_v37  ;;  %v1076_v6 = vunpack.c.l.bf16 %v1059_v16  ;;  %v854_v13 = vadd.f32 %v837_v61, %v788_v24  ;;  %v1335_v37 = vunpack.c.l.bf16 %v1342_v33 }
 0x10f   : > { %v967_v63 = vpop.f32.mrf.mxu3  ;;  %v527_v59 = vadd.f32 %v1663_v27, %v461_v45  ;;  %v724_v61 = vadd.f32 %v1687_v46, %v658_v32 }
 0x110   : > { %v986_v1 = vadd.f32 %v967_v63, %v920_v34  ;;  %v1108_v18 = vmul.f32 %v1076_v6, %v1076_v6  ;;  %v1085_v21 = vsel %vm1084_vm13, %v1076_v6, 0.0  ;;  %v462_v4 = vadd.f32 %v1707_v53, %v1335_v37 }
 0x111   : > { %v593_v34 = vadd.f32 %v1685_v12, %v527_v59  ;;  %v1336_v12 = vunpack.c.h.bf16 %v1342_v33 }
 0x112   : > { %v1052_v7 = vadd.f32 %v1033_v30, %v986_v1  ;;  %v1036_v10 = vpop.f32.mrf.mxu0  ;;  %v1116_v48 = vsel %vm1084_vm13, %v1108_v18, 0.0  ;;  %v528_v15 = vadd.f32 %v1661_v25, %v462_v4 }
 0x113   : > { %v659_v6 = vadd.f32 %v1698_v49, %v593_v34 }
 0x114   : > { %v1060_v11 = vpack.c.bf16 %v1052_v7, %v1052_v7  ;;  %v790_v7 = vadd.f32 %v1681_v3, %v724_v61 }
 0x115   : > { %v904_v40 = vpop.f32.mrf.mxu2  ;;  %v839_v17 = vpop.f32.mrf.mxu1 }
 0x116   : > { %1069 = vst.msk [vmem:[%s1734_s16 + $0x4] sm:$0xf] %vm1067_vm12, %v1060_v11  ;;  %v1077_v43 = vunpack.c.l.bf16 %v1060_v11  ;;  %v921_v19 = vadd.f32 %v904_v40, %v854_v13  ;;  %v855_v16 = vadd.f32 %v839_v17, %v789_v31  ;;  %v725_v40 = vadd.f32 %v1702_v52, %v659_v6 }
 0x117   : > { %v970_v38 = vpop.f32.mrf.mxu3 }
 0x118   : > { %v1086_v22 = vsel %vm1084_vm13, %v1077_v43, 0.0  ;;  %v1109_v23 = vmul.f32 %v1077_v43, %v1077_v43  ;;  %v987_v28 = vadd.f32 %v970_v38, %v921_v19  ;;  %v594_v43 = vadd.f32 %v1700_v50, %v528_v15 }
 0x119   : > { %v1087_v26 = vadd.f32 %v1086_v22, %v1085_v21  ;;  %v463_v38 = vadd.f32 %v1707_v53, %v1336_v12 }
 0x11a   : > { %v1117_v44 = vsel %vm1084_vm13, %v1109_v23, 0.0  ;;  %v1053_v51 = vadd.f32 %v1036_v10, %v987_v28  ;;  %v1038_v54 = vpop.f32.mrf.mxu0  ;;  %v660_v22 = vadd.f32 %v1712_v56, %v594_v43  ;;  %v791_v23 = vadd.f32 %v1695_v47, %v725_v40 }
 0x11b   : > { %v1118_v35 = vadd.f32 %v1117_v44, %v1116_v48  ;;  %v529_v33 = vadd.f32 %v1665_v29, %v463_v38 }
 0x11c   : > { %v1061_v30 = vpack.c.bf16 %v1053_v51, %v1053_v51  ;;  %v726_v32 = vadd.f32 %v1716_v60, %v660_v22 }
 0x11d   : > { %v906_v58 = vpop.f32.mrf.mxu2  ;;  %v842_v36 = vpop.f32.mrf.mxu1  ;;  %v595_v51 = vadd.f32 %v1714_v57, %v529_v33 }
 0x11e   : > { %1070 = vst.msk [vmem:[%s1734_s16 + $0x8] sm:$0xf] %vm1067_vm12, %v1061_v30  ;;  %v1078_v42 = vunpack.c.l.bf16 %v1061_v30  ;;  %v922_v9 = vadd.f32 %v906_v58, %v855_v16  ;;  %v856_v13 = vadd.f32 %v842_v36, %v790_v7  ;;  %v792_v60 = vadd.f32 %v1710_v55, %v726_v32 }
 0x11f   : > { %v972_v62 = vpop.f32.mrf.mxu3  ;;  %v661_v16 = vadd.f32 %v1722_v2, %v595_v51 }
 0x120   : > { %v1088_v39 = vsel %vm1084_vm13, %v1078_v42, 0.0  ;;  %v1110_v63 = vmul.f32 %v1078_v42, %v1078_v42  ;;  %v988_v1 = vadd.f32 %v972_v62, %v922_v9 }
 0x121   : > { %v1089_v5 = vadd.f32 %v1088_v39, %v1087_v26  ;;  %v727_v42 = vadd.f32 %v1724_v8, %v661_v16 }
 0x122   : > { %v1119_v27 = vsel %vm1084_vm13, %v1110_v63, 0.0  ;;  %v1054_v46 = vadd.f32 %v1038_v54, %v988_v1  ;;  %v1041_v10 = vpop.f32.mrf.mxu0 }
 0x123   : > { %v1120_v24 = vadd.f32 %v1119_v27, %v1118_v35  ;;  %v793_v6 = vadd.f32 %v1719_v0, %v727_v42 }
 0x124   : > { %v1062_v11 = vpack.c.bf16 %v1054_v46, %v1054_v46 }
 0x125   : > { %v909_v41 = vpop.f32.mrf.mxu2  ;;  %v844_v14 = vpop.f32.mrf.mxu1 }
 0x126   : > { %1071 = vst.msk [vmem:[%s1734_s16 + $0xc] sm:$0xf] %vm1067_vm12, %v1062_v11  ;;  %v1079_v17 = vunpack.c.l.bf16 %v1062_v11  ;;  %v923_v49 = vadd.f32 %v909_v41, %v856_v13  ;;  %v857_v26 = vadd.f32 %v844_v14, %v791_v23 }
 0x127   : > { %v975_v18 = vpop.f32.mrf.mxu3 }
 0x128   : > { %v1090_v3 = vsel %vm1084_vm13, %v1079_v17, 0.0  ;;  %v1111_v19 = vmul.f32 %v1079_v17, %v1079_v17  ;;  %v989_v20 = vadd.f32 %v975_v18, %v923_v49 }
 0x129   : > { %v1091_v21 = vadd.f32 %v1090_v3, %v1089_v5 }
 0x12a   : > { %v1121_v25 = vsel %vm1084_vm13, %v1111_v19, 0.0  ;;  %v1055_v52 = vadd.f32 %v1041_v10, %v989_v20  ;;  %v1043_v31 = vpop.f32.mrf.mxu0 }
 0x12b   : > { %v1122_v28 = vadd.f32 %v1121_v25, %v1120_v24 }
 0x12c   : > { %v1063_v45 = vpack.c.bf16 %v1055_v52, %v1055_v52 }
 0x12d   : > { %v911_v50 = vpop.f32.mrf.mxu2  ;;  %v847_v56 = vpop.f32.mrf.mxu1 }
 0x12e   : > { %1072 = vst.msk [vmem:[%s1734_s16 + $0x10] sm:$0xf] %vm1067_vm12, %v1063_v45  ;;  %v1080_v53 = vunpack.c.l.bf16 %v1063_v45  ;;  %v924_v48 = vadd.f32 %v911_v50, %v857_v26  ;;  %v858_v59 = vadd.f32 %v847_v56, %v792_v60 }
 0x12f   : > { %v977_v44 = vpop.f32.mrf.mxu3 }
 0x130   : > { %v1092_v47 = vsel %vm1084_vm13, %v1080_v53, 0.0  ;;  %v1112_v54 = vmul.f32 %v1080_v53, %v1080_v53  ;;  %v990_v35 = vadd.f32 %v977_v44, %v924_v48 }
 0x131   : > { %v1093_v30 = vadd.f32 %v1092_v47, %v1091_v21 }
 0x132   : > { %v1123_v29 = vsel %vm1084_vm13, %v1112_v54, 0.0  ;;  %v1056_v37 = vadd.f32 %v1043_v31, %v990_v35  ;;  %v1046_v62 = vpop.f32.mrf.mxu0 }
 0x133   : > { %v1124_v58 = vadd.f32 %v1123_v29, %v1122_v28 }
 0x134   : > { %v1064_v36 = vpack.c.bf16 %v1056_v37, %v1056_v37 }
 0x135   : > { %v914_v61 = vpop.f32.mrf.mxu2  ;;  %v849_v4 = vpop.f32.mrf.mxu1 }
 0x136   : > { %1073 = vst.msk [vmem:[%s1734_s16 + $0x14] sm:$0xf] %vm1067_vm12, %v1064_v36  ;;  %v1081_v57 = vunpack.c.l.bf16 %v1064_v36  ;;  %v925_v9 = vadd.f32 %v914_v61, %v858_v59  ;;  %v859_v46 = vadd.f32 %v849_v4, %v793_v6 }
 0x137   : > { %v980_v34 = vpop.f32.mrf.mxu3 }
 0x138   : > { %v1094_v2 = vsel %vm1084_vm13, %v1081_v57, 0.0  ;;  %v1113_v39 = vmul.f32 %v1081_v57, %v1081_v57  ;;  %v991_v63 = vadd.f32 %v980_v34, %v925_v9 }
 0x139   : > { %v1095_v1 = vadd.f32 %v1094_v2, %v1093_v30 }
 0x13a   : > { %v1125_v55 = vsel %vm1084_vm13, %v1113_v39, 0.0  ;;  %v1057_v5 = vadd.f32 %v1046_v62, %v991_v63  ;;  %v1048_v15 = vpop.f32.mrf.mxu0 }
 0x13b   : > { %v1126_v27 = vadd.f32 %v1125_v55, %v1124_v58 }
 0x13c   : > { %v1065_v8 = vpack.c.bf16 %v1057_v5, %v1057_v5 }
 0x13d   : > { %v916_v7 = vpop.f32.mrf.mxu2 }
 0x13e   : > { %1074 = vst.msk [vmem:[%s1734_s16 + $0x18] sm:$0xf] %vm1067_vm12, %v1065_v8  ;;  %v1082_v24 = vunpack.c.l.bf16 %v1065_v8  ;;  %v926_v10 = vadd.f32 %v916_v7, %v859_v46 }
 0x13f   : > { %v982_v11 = vpop.f32.mrf.mxu3 }
 0x140   : > { %v1096_v13 = vsel %vm1084_vm13, %v1082_v24, 0.0  ;;  %v1114_v12 = vmul.f32 %v1082_v24, %v1082_v24  ;;  %v992_v41 = vadd.f32 %v982_v11, %v926_v10 }
 0x141   : > { %v1097_v14 = vadd.f32 %v1096_v13, %v1095_v1 }
 0x142   : > { %v1127_v40 = vsel %vm1084_vm13, %v1114_v12, 0.0  ;;  %v1058_v0 = vadd.f32 %v1048_v15, %v992_v41 }
 0x143   : > { %v1128_v17 = vadd.f32 %v1127_v40, %v1126_v27 }
 0x144   : > { %v1066_v49 = vpack.c.bf16 %v1058_v0, %v1058_v0 }
 0x146   : > { %1075 = vst.msk [vmem:[%s1734_s16 + $0x1c] sm:$0xf] %vm1067_vm12, %v1066_v49  ;;  %v1083_v18 = vunpack.c.l.bf16 %v1066_v49 }
 0x148   : > { %v1098_v43 = vsel %vm1084_vm13, %v1083_v18, 0.0  ;;  %v1115_v3 = vmul.f32 %v1083_v18, %v1083_v18 }
 0x149   : > { %v1099_v19 = vadd.f32 %v1098_v43, %v1097_v14 }
 0x14a   : > { %v1129_v20 = vsel %vm1084_vm13, %v1115_v3, 0.0 }
 0x14b   : > { %v1100_v38 = vrot.slane %v1099_v19, 4  ;;  %v1130_v21 = vadd.f32 %v1129_v20, %v1128_v17 }
 0x14d   : > { %v1101_v22 = vadd.f32 %v1100_v38, %v1099_v19  ;;  %v1131_v25 = vrot.slane %v1130_v21, 4 }
 0x14f   : > { %v1102_v52 = vrot.slane %v1101_v22, 2  ;;  %v1132_v23 = vadd.f32 %v1131_v25, %v1130_v21 }
 0x151   : > { %v1103_v28 = vadd.f32 %v1102_v52, %v1101_v22  ;;  %v1133_v45 = vrot.slane %v1132_v23, 2 }
 0x153   : > { %v1104_v26 = vrot.slane %v1103_v28, 1  ;;  %v1134_v31 = vadd.f32 %v1133_v45, %v1132_v23 }
 0x155   : > { %v1105_v50 = vadd.f32 %v1104_v26, %v1103_v28  ;;  %v1135_v33 = vrot.slane %v1134_v31, 1 }
 0x157   : > { %1107 = vst.msk [vmem:[%s309_s19] sm:$0x1] %vm1106_vm14, %v1105_v50  ;;  %v1136_v32 = vadd.f32 %v1135_v33, %v1134_v31 }
 0x159   : > { %1137 = vst.msk [vmem:[%s309_s19 + $0x1] sm:$0x1] %vm1106_vm14, %v1136_v32 }
 0x15a PF: > { %s18_s24 = sadd.s32 1, %s1380_s24  }
 0x15b   : > { %p15_p4 = scmp.ge.s32.totalorder %s18_s24, 4  }
 0x15d   :  { %17 = sbr.rel (!%p15_p4) target bundleno = 1 (0x1), region = 100 }

</bundles_post_ra>
